<compile_context>
chip_gen: v7x
topology: tpu7x:2x2x1
jax: 0.10.0
libtpu: 0.0.40
codegen_flags: <defaults>
</compile_context>

<pallas_src>
import functools

import jax
import jax.numpy as jnp
from jax.experimental import pallas as pl
from jax.experimental.pallas import tpu as pltpu

D_IN = 128 * 3      # 384
D_HID = 512
D_OUT = 16
D_OUT_PAD = 128     # lane-dense padded output width (multiple of 128)


def _round_up(n, m):
    return ((n + m - 1) // m) * m


def _default_tile_and_vmem():
    """Per-generation defaults: bigger tiles on 128 MiB-VMEM chips (v5e/v6e),
    capped tiles + lower scoped limit on 64 MiB-VMEM chips (v7x)."""
    tile_b, vmem = 1024, 48 * 1024 * 1024          # safe everywhere
    try:
        info = pltpu.get_tpu_info()
        vmem_cap = getattr(info, "vmem_capacity_bytes", None)
        if vmem_cap is not None and vmem_cap >= 96 * 1024 * 1024:
            tile_b, vmem = 2048, 64 * 1024 * 1024  # v5e / v6e: 128 MiB VMEM
    except Exception:
        pass
    return tile_b, vmem


def _mlp_kernel(x_ref,
                w1_ref, b1_ref,
                w2_ref, b2_ref,
                w3_ref, b3_ref,
                w4_ref, b4_ref,
                o_ref):
    """Fused 4-layer MLP for one (TILE_B, 384) bf16 batch tile.

    Each matmul accumulates in f32 on the MXU; bias add + ReLU run in f32 on
    the VPU; activations are re-cast to bf16 for the next MXU pass.
    """
    h = jnp.dot(x_ref[...], w1_ref[...],
                preferred_element_type=jnp.float32)              # (TB, 512) f32
    h = jnp.maximum(h + b1_ref[...], 0.0).astype(jnp.bfloat16)

    h = jnp.dot(h, w2_ref[...], preferred_element_type=jnp.float32)
    h = jnp.maximum(h + b2_ref[...], 0.0).astype(jnp.bfloat16)

    h = jnp.dot(h, w3_ref[...], preferred_element_type=jnp.float32)
    h = jnp.maximum(h + b3_ref[...], 0.0).astype(jnp.bfloat16)

    out = jnp.dot(h, w4_ref[...], preferred_element_type=jnp.float32)  # (TB, 128)
    o_ref[...] = out + b4_ref[...]


def prepare_params(torch_params):
    """ONE-TIME (outside jit) conversion of PyTorch-convention parameters.

    torch_params: 4 (weight, bias) pairs in PC_Encoder order, weight (out, in),
    bias (out,) or (1, out) — exactly the state_dict convention.

    Returns kernel-ready arrays: weights transposed to (in, out) and cast to
    bf16, biases reshaped to (1, out) f32, and the final layer zero-padded from
    16 to 128 output lanes.  Call this once at load time, not per step.
    """
    dims = [(D_IN, D_HID), (D_HID, D_HID), (D_HID, D_HID), (D_HID, D_OUT)]
    assert len(torch_params) == len(dims), "expected 4 linear layers"
    prepped = []
    for i, ((w, b), (din, dout)) in enumerate(zip(torch_params, dims)):
        w = jnp.asarray(w, jnp.float32)
        b = jnp.asarray(b, jnp.float32).reshape(1, -1)     # (out,) -> (1, out)
        assert w.shape == (dout, din), f"layer {i}: weight shape {w.shape}"
        assert b.shape == (1, dout), f"layer {i}: bias shape {b.shape}"
        w = w.T                                            # (out,in) -> (in,out)
        if i == len(dims) - 1:                             # pad 16 -> 128 lanes
            w = jnp.pad(w, ((0, 0), (0, D_OUT_PAD - D_OUT)))
            b = jnp.pad(b, ((0, 0), (0, D_OUT_PAD - D_OUT)))
        prepped.append(w.astype(jnp.bfloat16))              # bf16 MXU weights
        prepped.append(b)                                   # f32 biases
    return tuple(prepped)


@functools.partial(jax.jit, static_argnames=("tile_b", "vmem_limit_bytes"))
def pc_encoder_forward(x, prepped_params, tile_b=None, vmem_limit_bytes=None):
    """x: (B, 128, 3) float32, prepped_params from prepare_params().
    Returns logits: (B, 16) float32."""
    B = x.shape[0]
    # nn.Flatten() fused with the bf16 cast (one cheap pass; halves x DMA).
    x_flat = x.reshape(B, D_IN).astype(jnp.bfloat16)

    w1, b1, w2, b2, w3, b3, w4, b4 = prepped_params

    if tile_b is None or vmem_limit_bytes is None:
        d_tb, d_vmem = _default_tile_and_vmem()
        tile_b = d_tb if tile_b is None else tile_b
        vmem_limit_bytes = d_vmem if vmem_limit_bytes is None else vmem_limit_bytes

    # bf16 packs two rows per sublane -> batch tile must be a multiple of 16.
    tile_b = max(16, (int(tile_b) // 16) * 16)

    # Balanced tiling: minimize zero-row padding for ragged B, and keep the
    # grid length even (when >1) so v7x's two TensorCores both get work.
    n_tiles = -(-B // tile_b)
    if n_tiles > 1 and n_tiles % 2:
        n_tiles += 1
    tb = _round_up(-(-B // n_tiles), 16)
    b_pad = _round_up(B, tb)
    if b_pad != B:
        x_flat = jnp.pad(x_flat, ((0, b_pad - B), (0, 0)))
    grid = (b_pad // tb,)

    def resident(shape):  # weights/biases: same block every step -> VMEM-resident
        return pl.BlockSpec(shape, lambda i: (0, 0))

    flops = 2 * b_pad * (D_IN * D_HID + 2 * D_HID * D_HID + D_HID * D_OUT_PAD)
    bytes_accessed = (
        b_pad * D_IN * 2                                                  # x (bf16)
        + 2 * (D_IN * D_HID + 2 * D_HID * D_HID + D_HID * D_OUT_PAD)      # bf16 W
        + 4 * (3 * D_HID + D_OUT_PAD)                                     # f32 b
        + b_pad * D_OUT_PAD * 4)                                          # output

    out = pl.pallas_call(
        _mlp_kernel,
        out_shape=jax.ShapeDtypeStruct((b_pad, D_OUT_PAD), jnp.float32),
        grid=grid,
        in_specs=[
            pl.BlockSpec((tb, D_IN), lambda i: (i, 0)),   # bf16 x tile (pipelined)
            resident((D_IN, D_HID)), resident((1, D_HID)),
            resident((D_HID, D_HID)), resident((1, D_HID)),
            resident((D_HID, D_HID)), resident((1, D_HID)),
            resident((D_HID, D_OUT_PAD)), resident((1, D_OUT_PAD)),
        ],
        out_specs=pl.BlockSpec((tb, D_OUT_PAD), lambda i: (i, 0)),
        compiler_params=pltpu.CompilerParams(
            dimension_semantics=("parallel",),            # v7x: 2 TCs share batch
            vmem_limit_bytes=vmem_limit_bytes),
        cost_estimate=pl.CostEstimate(
            flops=flops, bytes_accessed=bytes_accessed, transcendentals=0),
    )(x_flat, w1, b1, w2, b2, w3, b3, w4, b4)

    return out[:B, :D_OUT]


def init_params(key):
    """Deterministic synthetic params in PyTorch convention:
    nn.Linear(in, out) -> weight (out, in), bias (out,), U(-1/sqrt(in), 1/sqrt(in))."""
    dims = [(D_IN, D_HID), (D_HID, D_HID), (D_HID, D_HID), (D_HID, D_OUT)]
    params = []
    for din, dout in dims:
        key, kw, kb = jax.random.split(key, 3)
        bound = 1.0 / (din ** 0.5)
        w = jax.random.uniform(kw, (dout, din), jnp.float32, -bound, bound)
        b = jax.random.uniform(kb, (dout,), jnp.float32, -bound, bound)
        params.append((w, b))
    return params


def _reference_forward(x, torch_params):
    """Pure f32 JAX reference using PyTorch-convention params."""
    h = x.reshape(x.shape[0], -1)
    for i, (w, b) in enumerate(torch_params):
        h = h @ w.T + b
        if i < len(torch_params) - 1:
            h = jnp.maximum(h, 0.0)
    return h


if __name__ == "__main__":
    key = jax.random.PRNGKey(0)
    kx, kp = jax.random.split(key)

    B = 8  # small demo batch; input shape implied by the module: (B, 128, 3)
    x = jax.random.normal(kx, (B, 128, 3), jnp.float32)

    torch_params = init_params(kp)          # PyTorch-convention shapes
    params = prepare_params(torch_params)   # one-time kernel-ready prep (no per-call cost)

    logits = pc_encoder_forward(x, params)
    jax.block_until_ready(logits)

    # sanity check against a pure f32 JAX reference (kernel uses bf16 MXU
    # inputs with f32 accumulation, so tolerance is relaxed vs pure f32)
    ref = _reference_forward(x, torch_params)
    assert logits.shape == (B, D_OUT)
    err = float(jnp.max(jnp.abs(logits - ref)))
    scale = float(jnp.max(jnp.abs(ref)))
    assert err <= max(3e-2, 3e-2 * scale), f"mismatch: err={err}, scale={scale}"

    print("KERNEL_OK")
</pallas_src>

<mosaic_0001>
module attributes {stable_mosaic.version = 11 : i64} {
  func.func @_mlp_kernel(%arg0: i32, %arg1: memref<16x384xbf16, #tpu.memory_space<vmem>>, %arg2: memref<384x512xbf16, #tpu.memory_space<vmem>>, %arg3: memref<1x512xf32, #tpu.memory_space<vmem>>, %arg4: memref<512x512xbf16, #tpu.memory_space<vmem>>, %arg5: memref<1x512xf32, #tpu.memory_space<vmem>>, %arg6: memref<512x512xbf16, #tpu.memory_space<vmem>>, %arg7: memref<1x512xf32, #tpu.memory_space<vmem>>, %arg8: memref<512x128xbf16, #tpu.memory_space<vmem>>, %arg9: memref<1x128xf32, #tpu.memory_space<vmem>>, %arg10: memref<16x128xf32, #tpu.memory_space<vmem>>) attributes {dimension_semantics = [#tpu.dimension_semantics<parallel>], iteration_bounds = array<i64: 1>, scalar_prefetch = 0 : i64, scratch_operands = 0 : i64, tpu.core_type = #tpu.core_type<tc>, window_params = [{transform_indices = @transform_0, window_bounds = array<i64: 16, 384>}, {pipeline_mode = #tpu.pipeline_mode<synchronous>, transform_indices = @transform_1, window_bounds = array<i64: 384, 512>}, {pipeline_mode = #tpu.pipeline_mode<synchronous>, transform_indices = @transform_2, window_bounds = array<i64: 1, 512>}, {pipeline_mode = #tpu.pipeline_mode<synchronous>, transform_indices = @transform_3, window_bounds = array<i64: 512, 512>}, {pipeline_mode = #tpu.pipeline_mode<synchronous>, transform_indices = @transform_4, window_bounds = array<i64: 1, 512>}, {pipeline_mode = #tpu.pipeline_mode<synchronous>, transform_indices = @transform_5, window_bounds = array<i64: 512, 512>}, {pipeline_mode = #tpu.pipeline_mode<synchronous>, transform_indices = @transform_6, window_bounds = array<i64: 1, 512>}, {pipeline_mode = #tpu.pipeline_mode<synchronous>, transform_indices = @transform_7, window_bounds = array<i64: 512, 128>}, {pipeline_mode = #tpu.pipeline_mode<synchronous>, transform_indices = @transform_8, window_bounds = array<i64: 1, 128>}, {transform_indices = @transform_9, window_bounds = array<i64: 16, 128>}]} {
    %c0 = arith.constant 0 : index
    %c0_0 = arith.constant 0 : index
    %0 = vector.load %arg1[%c0, %c0_0] : memref<16x384xbf16, #tpu.memory_space<vmem>>, vector<16x384xbf16>
    %c0_1 = arith.constant 0 : index
    %c0_2 = arith.constant 0 : index
    %1 = vector.load %arg2[%c0_1, %c0_2] : memref<384x512xbf16, #tpu.memory_space<vmem>>, vector<384x512xbf16>
    %cst = arith.constant dense<0.000000e+00> : vector<16x512xf32>
    %2 = tpu.matmul %0, %1, %cst {dimension_numbers = #tpu.dot_dimension_numbers<[1], [0], [0], [1], [0, 0, 1, 1], [], []>} : vector<16x384xbf16>, vector<384x512xbf16>, vector<16x512xf32> -> vector<16x512xf32>
    %c0_3 = arith.constant 0 : index
    %c0_4 = arith.constant 0 : index
    %3 = vector.load %arg3[%c0_3, %c0_4] : memref<1x512xf32, #tpu.memory_space<vmem>>, vector<1x512xf32>
    %4 = vector.broadcast %3 : vector<1x512xf32> to vector<16x512xf32>
    %5 = arith.addf %2, %4 : vector<16x512xf32>
    %cst_5 = arith.constant 0.000000e+00 : f32
    %6 = vector.broadcast %cst_5 : f32 to vector<16x512xf32>
    %7 = arith.maximumf %5, %6 : vector<16x512xf32>
    %8 = arith.truncf %7 : vector<16x512xf32> to vector<16x512xbf16>
    %c0_6 = arith.constant 0 : index
    %c0_7 = arith.constant 0 : index
    %9 = vector.load %arg4[%c0_6, %c0_7] : memref<512x512xbf16, #tpu.memory_space<vmem>>, vector<512x512xbf16>
    %cst_8 = arith.constant dense<0.000000e+00> : vector<16x512xf32>
    %10 = tpu.matmul %8, %9, %cst_8 {dimension_numbers = #tpu.dot_dimension_numbers<[1], [0], [0], [1], [0, 0, 1, 1], [], []>} : vector<16x512xbf16>, vector<512x512xbf16>, vector<16x512xf32> -> vector<16x512xf32>
    %c0_9 = arith.constant 0 : index
    %c0_10 = arith.constant 0 : index
    %11 = vector.load %arg5[%c0_9, %c0_10] : memref<1x512xf32, #tpu.memory_space<vmem>>, vector<1x512xf32>
    %12 = vector.broadcast %11 : vector<1x512xf32> to vector<16x512xf32>
    %13 = arith.addf %10, %12 : vector<16x512xf32>
    %cst_11 = arith.constant 0.000000e+00 : f32
    %14 = vector.broadcast %cst_11 : f32 to vector<16x512xf32>
    %15 = arith.maximumf %13, %14 : vector<16x512xf32>
    %16 = arith.truncf %15 : vector<16x512xf32> to vector<16x512xbf16>
    %c0_12 = arith.constant 0 : index
    %c0_13 = arith.constant 0 : index
    %17 = vector.load %arg6[%c0_12, %c0_13] : memref<512x512xbf16, #tpu.memory_space<vmem>>, vector<512x512xbf16>
    %cst_14 = arith.constant dense<0.000000e+00> : vector<16x512xf32>
    %18 = tpu.matmul %16, %17, %cst_14 {dimension_numbers = #tpu.dot_dimension_numbers<[1], [0], [0], [1], [0, 0, 1, 1], [], []>} : vector<16x512xbf16>, vector<512x512xbf16>, vector<16x512xf32> -> vector<16x512xf32>
    %c0_15 = arith.constant 0 : index
    %c0_16 = arith.constant 0 : index
    %19 = vector.load %arg7[%c0_15, %c0_16] : memref<1x512xf32, #tpu.memory_space<vmem>>, vector<1x512xf32>
    %20 = vector.broadcast %19 : vector<1x512xf32> to vector<16x512xf32>
    %21 = arith.addf %18, %20 : vector<16x512xf32>
    %cst_17 = arith.constant 0.000000e+00 : f32
    %22 = vector.broadcast %cst_17 : f32 to vector<16x512xf32>
    %23 = arith.maximumf %21, %22 : vector<16x512xf32>
    %24 = arith.truncf %23 : vector<16x512xf32> to vector<16x512xbf16>
    %c0_18 = arith.constant 0 : index
    %c0_19 = arith.constant 0 : index
    %25 = vector.load %arg8[%c0_18, %c0_19] : memref<512x128xbf16, #tpu.memory_space<vmem>>, vector<512x128xbf16>
    %cst_20 = arith.constant dense<0.000000e+00> : vector<16x128xf32>
    %26 = tpu.matmul %24, %25, %cst_20 {dimension_numbers = #tpu.dot_dimension_numbers<[1], [0], [0], [1], [0, 0, 1, 1], [], []>} : vector<16x512xbf16>, vector<512x128xbf16>, vector<16x128xf32> -> vector<16x128xf32>
    %c0_21 = arith.constant 0 : index
    %c0_22 = arith.constant 0 : index
    %27 = vector.load %arg9[%c0_21, %c0_22] : memref<1x128xf32, #tpu.memory_space<vmem>>, vector<1x128xf32>
    %28 = vector.broadcast %27 : vector<1x128xf32> to vector<16x128xf32>
    %29 = arith.addf %26, %28 : vector<16x128xf32>
    %c0_23 = arith.constant 0 : index
    %c0_24 = arith.constant 0 : index
    %30 = vector.load %arg10[%c0_23, %c0_24] : memref<16x128xf32, #tpu.memory_space<vmem>>, vector<16x128xf32>
    tpu.vector_store %arg10[%c0_23, %c0_24], %29 {strides = array<i32>} : memref<16x128xf32, #tpu.memory_space<vmem>>, vector<16x128xf32>,
    return
  }
  func.func @transform_0(%arg0: i32) -> (i32, i32) {
    %c0_i32 = arith.constant 0 : i32
    %c0_i32_0 = arith.constant 0 : i32
    return %arg0, %c0_i32 : i32, i32
  }
  func.func @transform_1(%arg0: i32) -> (i32, i32) {
    %c0_i32 = arith.constant 0 : i32
    %c0_i32_0 = arith.constant 0 : i32
    %c0_i32_1 = arith.constant 0 : i32
    return %c0_i32, %c0_i32_0 : i32, i32
  }
  func.func @transform_2(%arg0: i32) -> (i32, i32) {
    %c0_i32 = arith.constant 0 : i32
    %c0_i32_0 = arith.constant 0 : i32
    %c0_i32_1 = arith.constant 0 : i32
    return %c0_i32, %c0_i32_0 : i32, i32
  }
  func.func @transform_3(%arg0: i32) -> (i32, i32) {
    %c0_i32 = arith.constant 0 : i32
    %c0_i32_0 = arith.constant 0 : i32
    %c0_i32_1 = arith.constant 0 : i32
    return %c0_i32, %c0_i32_0 : i32, i32
  }
  func.func @transform_4(%arg0: i32) -> (i32, i32) {
    %c0_i32 = arith.constant 0 : i32
    %c0_i32_0 = arith.constant 0 : i32
    %c0_i32_1 = arith.constant 0 : i32
    return %c0_i32, %c0_i32_0 : i32, i32
  }
  func.func @transform_5(%arg0: i32) -> (i32, i32) {
    %c0_i32 = arith.constant 0 : i32
    %c0_i32_0 = arith.constant 0 : i32
    %c0_i32_1 = arith.constant 0 : i32
    return %c0_i32, %c0_i32_0 : i32, i32
  }
  func.func @transform_6(%arg0: i32) -> (i32, i32) {
    %c0_i32 = arith.constant 0 : i32
    %c0_i32_0 = arith.constant 0 : i32
    %c0_i32_1 = arith.constant 0 : i32
    return %c0_i32, %c0_i32_0 : i32, i32
  }
  func.func @transform_7(%arg0: i32) -> (i32, i32) {
    %c0_i32 = arith.constant 0 : i32
    %c0_i32_0 = arith.constant 0 : i32
    %c0_i32_1 = arith.constant 0 : i32
    return %c0_i32, %c0_i32_0 : i32, i32
  }
  func.func @transform_8(%arg0: i32) -> (i32, i32) {
    %c0_i32 = arith.constant 0 : i32
    %c0_i32_0 = arith.constant 0 : i32
    %c0_i32_1 = arith.constant 0 : i32
    return %c0_i32, %c0_i32_0 : i32, i32
  }
  func.func @transform_9(%arg0: i32) -> (i32, i32) {
    %c0_i32 = arith.constant 0 : i32
    %c0_i32_0 = arith.constant 0 : i32
    return %arg0, %c0_i32 : i32, i32
  }
}

</mosaic_0001>

<bundles_post_ra>
// kernel: pc_encoder_forward.1
= control target key start
LH: loop header
LB: loop body
LE: loop exit
PB: predicated region body
PF: predicated region fallthrough
CT: control target
= control target key end

     0   :  { %14 = vsyncpa [#allocation3], 0  ;;  %s4743_s0 = inlined_call_operand.vmem [shape: bf16[16,384], index: 0, kind: input, shape index: {}]   ;;  %s4744_s1 = inlined_call_operand.vmem [shape: bf16[384,512], index: 1, kind: input, shape index: {}]   ;;  %s4745_s2 = inlined_call_operand.vmem [shape: f32[1,512], index: 2, kind: input, shape index: {}]   ;;  %s4746_s3 = inlined_call_operand.hbm [shape: bf16[512,512], index: 3, kind: input, shape index: {}]   ;;  %s4747_s4 = inlined_call_operand.vmem [shape: f32[1,512], index: 4, kind: input, shape index: {}]   ;;  %s4748_s5 = inlined_call_operand.hbm [shape: bf16[512,512], index: 5, kind: input, shape index: {}]   ;;  %s4749_s6 = inlined_call_operand.vmem [shape: f32[1,512], index: 6, kind: input, shape index: {}]   ;;  %s4750_s7 = inlined_call_operand.hbm [shape: bf16[512,128], index: 7, kind: input, shape index: {}]   ;;  %s4751_s8 = inlined_call_operand.vmem [shape: f32[1,128], index: 8, kind: input, shape index: {}]   ;;  %s4752_s9 = inlined_call_operand.vmem [shape: f32[16,128], index: 9, kind: output, shape index: {}]  }
   0x1   :  { %15 = vsyncpa [#allocation5], 0  ;;  %s4299_s30 = smov [#allocation4]   ;;  %s4300_s11 = smov [#allocation2]  }
   0x2   :  { %s41_s10 = sshll.u32 %s4299_s30, 4  ;;  %s27_s12 = sshll.u32 %s4300_s11, 4  ;;  %s42_s10 = int_to_ptr.vmem [resolvable:$true] %s41_s10  ;;  %s4357_s12 = int_to_ptr.vmem [resolvable:$true] %s27_s12 }
   0x3   :  { %s4229_s15 = scalar_lea.hbm %s4748_s5, 16384 }
   0x4   :  { %p4230_p0 = scmp.ne.s32.totalorder %s4748_s5, %s4229_s15  ;;  %p4233_p1 = scmp.lt.u32.totalorder %s4229_s15, %s4748_s5 }
   0x6   :  { %p4235_p2 = pnand %p4233_p1, %p4230_p0 }
   0x8   :  { %4238 = shalt.err (!%p4235_p2)
}
   0x9   :  { %s4239_s20 = scalar_lea.vmem %s42_s10, 16384  ;;  %p4244_p4 = scmp.lt.s32.totalorder %s42_s10, %s42_s10 }
   0xa   :  { %p4240_p3 = scmp.ne.s32.totalorder %s42_s10, %s4239_s20  ;;  %p4245_p5 = scmp.lt.s32.totalorder %s4239_s20, %s4239_s20 }
   0xc   :  { %p4246_p6 = por %p4245_p5, %p4244_p4 }
   0xe   :  { %p4247_p7 = pnand %p4246_p6, %p4240_p3 }
  0x10   :  { %4250 = shalt.err (!%p4247_p7)
}
  0x11   :  { %s4301_s21 = smov 256   ;;  %s4302_s22 = smov 16  }
  0x12   :  { %47 = dma.hbm_to_vmem [thread:$0]  %s4748_s5, 16384, %s42_s10, [#allocation5], %s4301_s21, %s4301_s21, %s4302_s22  }
  0x13   :  { %s4251_s27 = scalar_lea.hbm %s4746_s3, 16384 }
  0x14   :  { %p4252_p8 = scmp.ne.s32.totalorder %s4746_s3, %s4251_s27  ;;  %p4255_p9 = scmp.lt.u32.totalorder %s4251_s27, %s4746_s3 }
  0x16   :  { %p4257_p10 = pnand %p4255_p9, %p4252_p8 }
  0x18   :  { %4260 = shalt.err (!%p4257_p10)
}
  0x19   :  { %s4261_s13 = scalar_lea.vmem %s4357_s12, 16384  ;;  %p4266_p12 = scmp.lt.s32.totalorder %s4357_s12, %s4357_s12 }
  0x1a   :  { %p4262_p11 = scmp.ne.s32.totalorder %s4357_s12, %s4261_s13  ;;  %p4267_p13 = scmp.lt.s32.totalorder %s4261_s13, %s4261_s13 }
  0x1c   :  { %p4268_p0 = por %p4267_p13, %p4266_p12 }
  0x1e   :  { %p4269_p1 = pnand %p4268_p0, %p4262_p11 }
  0x20   :  { %4272 = shalt.err (!%p4269_p1)
}
  0x21   :  { %33 = dma.hbm_to_vmem [thread:$0]  %s4746_s3, 16384, %s4357_s12, [#allocation3], %s4301_s21, %s4301_s21, %s4302_s22  }
  0x22   :  { %s4303_s14 = smov [#allocation6]   ;;  %s4273_s18 = scalar_lea.hbm %s4750_s7, 4096 }
  0x23   :  { %s55_s15 = sshll.u32 %s4303_s14, 4  ;;  %p4274_p2 = scmp.ne.s32.totalorder %s4750_s7, %s4273_s18  ;;  %s56_s15 = int_to_ptr.vmem [resolvable:$true] %s55_s15 }
  0x24   :  { %p4277_p3 = scmp.lt.u32.totalorder %s4273_s18, %s4750_s7 }
  0x26   :  { %p4279_p4 = pnand %p4277_p3, %p4274_p2 }
  0x28   :  { %4282 = shalt.err (!%p4279_p4)
}
  0x29   :  { %s4283_s25 = scalar_lea.vmem %s56_s15, 4096  ;;  %p4288_p6 = scmp.lt.s32.totalorder %s56_s15, %s56_s15 }
  0x2a   :  { %p4284_p5 = scmp.ne.s32.totalorder %s56_s15, %s4283_s25  ;;  %p4289_p7 = scmp.lt.s32.totalorder %s4283_s25, %s4283_s25 }
  0x2c   :  { %p4290_p8 = por %p4289_p7, %p4288_p6 }
  0x2e   :  { %p4291_p9 = pnand %p4290_p8, %p4284_p5 }
  0x30   :  { %4294 = shalt.err (!%p4291_p9)
}
  0x31   :  { %s4304_s3 = smov 64   ;;  %s4305_s12 = smov 4  }
  0x32   :  { %61 = dma.hbm_to_vmem [thread:$0]  %s4750_s7, 4096, %s56_s15, [#allocation5], %s4304_s3, %s4304_s3, %s4305_s12  }
  0x33   :  { %4295 = dma.done.wait [#allocation3], 16384  }
  0x34   :  { %4296 = vsyncadd [#allocation3], 4294950912 }
  0x35   :  { %4297 = dma.done.wait [#allocation5], 20480  }
  0x36   :  { %4298 = vsyncadd [#allocation5], 4294946816  ;;  %v3665_v0 = vld [vmem:[%s4744_s1 + $0x4] ss:$16 sps:$4 sm:$0xff]   ;;  %v3667_v1 = vld [vmem:[%s4744_s1] ss:$16 sps:$4 sm:$0xff]  }
  0x37   :  { %692 = vmatprep.subr.bf16.mxu0 %v3665_v0  ;;  %v3668_v2 = vld [vmem:[%s4744_s1 + $0x24] ss:$16 sps:$4 sm:$0xff]   ;;  %v3670_v3 = vld [vmem:[%s4744_s1 + $0x20] ss:$16 sps:$4 sm:$0xff]   ;;  %v3689_v8 = vld [vmem:[%s4744_s1 + $0xc] ss:$16 sps:$4 sm:$0xff]  }
  0x38   :  { %693 = vmatpush1.bf16.msra.mxu0 %v3667_v1  ;;  %v3671_v4 = vld [vmem:[%s4744_s1 + $0x44] ss:$16 sps:$4 sm:$0xff]   ;;  %v3673_v5 = vld [vmem:[%s4744_s1 + $0x40] ss:$16 sps:$4 sm:$0xff]   ;;  %v3691_v9 = vld [vmem:[%s4744_s1 + $0x8] ss:$16 sps:$4 sm:$0xff]   ;;  %778 = vmatprep.subr.bf16.mxu1 %v3689_v8 }
  0x39   :  { %694 = vmatprep.subr.bf16.mxu0 %v3668_v2  ;;  %v3674_v6 = vld [vmem:[%s4744_s1 + $0x64] ss:$16 sps:$4 sm:$0xff]   ;;  %v3676_v7 = vld [vmem:[%s4744_s1 + $0x60] ss:$16 sps:$4 sm:$0xff]   ;;  %779 = vmatpush1.bf16.msra.mxu1 %v3691_v9  ;;  %v3695_v11 = vld [vmem:[%s4744_s1 + $0x2c] ss:$16 sps:$4 sm:$0xff]  }
  0x3a   :  { %v3677_v10 = vld [vmem:[%s4744_s1 + $0x84] ss:$16 sps:$4 sm:$0xff]   ;;  %v3697_v12 = vld [vmem:[%s4744_s1 + $0x28] ss:$16 sps:$4 sm:$0xff]   ;;  %v3679_v13 = vld [vmem:[%s4744_s1 + $0x80] ss:$16 sps:$4 sm:$0xff]   ;;  %780 = vmatprep.subr.bf16.mxu1 %v3695_v11 }
  0x3b   :  { %v3680_v14 = vld [vmem:[%s4744_s1 + $0xa4] ss:$16 sps:$4 sm:$0xff]   ;;  %v3701_v15 = vld [vmem:[%s4744_s1 + $0x4c] ss:$16 sps:$4 sm:$0xff]   ;;  %v3703_v16 = vld [vmem:[%s4744_s1 + $0x48] ss:$16 sps:$4 sm:$0xff]  }
  0x3c   :  { %695 = vmatpush1.bf16.msra.mxu0 %v3670_v3  ;;  %v3682_v17 = vld [vmem:[%s4744_s1 + $0xa0] ss:$16 sps:$4 sm:$0xff]   ;;  %v3707_v18 = vld [vmem:[%s4744_s1 + $0x6c] ss:$16 sps:$4 sm:$0xff]   ;;  %v3683_v19 = vld [vmem:[%s4744_s1 + $0xc4] ss:$16 sps:$4 sm:$0xff]  }
  0x3d   :  { %696 = vmatprep.subr.bf16.mxu0 %v3671_v4  ;;  %781 = vmatpush1.bf16.msra.mxu1 %v3697_v12  ;;  %v3709_v20 = vld [vmem:[%s4744_s1 + $0x68] ss:$16 sps:$4 sm:$0xff]   ;;  %v3685_v21 = vld [vmem:[%s4744_s1 + $0xc0] ss:$16 sps:$4 sm:$0xff]   ;;  %v3713_v22 = vld [vmem:[%s4744_s1 + $0x8c] ss:$16 sps:$4 sm:$0xff]  }
  0x3e   :  { %782 = vmatprep.subr.bf16.mxu1 %v3701_v15  ;;  %v3686_v23 = vld [vmem:[%s4744_s1 + $0xe4] ss:$16 sps:$4 sm:$0xff]   ;;  %v3715_v24 = vld [vmem:[%s4744_s1 + $0x88] ss:$16 sps:$4 sm:$0xff]   ;;  %v3688_v25 = vld [vmem:[%s4744_s1 + $0xe0] ss:$16 sps:$4 sm:$0xff]  }
  0x3f   :  { %v3719_v26 = vld [vmem:[%s4744_s1 + $0xac] ss:$16 sps:$4 sm:$0xff]   ;;  %v3692_v27 = vld [vmem:[%s4744_s1 + $0x104] ss:$16 sps:$4 sm:$0xff]   ;;  %v3721_v28 = vld [vmem:[%s4744_s1 + $0xa8] ss:$16 sps:$4 sm:$0xff]  }
  0x40   :  { %697 = vmatpush1.bf16.msra.mxu0 %v3673_v5  ;;  %v3694_v29 = vld [vmem:[%s4744_s1 + $0x100] ss:$16 sps:$4 sm:$0xff]   ;;  %v3725_v30 = vld [vmem:[%s4744_s1 + $0xcc] ss:$16 sps:$4 sm:$0xff]   ;;  %v3698_v31 = vld [vmem:[%s4744_s1 + $0x124] ss:$16 sps:$4 sm:$0xff]  }
  0x41   :  { %698 = vmatprep.subr.bf16.mxu0 %v3674_v6  ;;  %783 = vmatpush1.bf16.msra.mxu1 %v3703_v16  ;;  %v3727_v32 = vld [vmem:[%s4744_s1 + $0xc8] ss:$16 sps:$4 sm:$0xff]   ;;  %v3742_v33 = vld [vmem:[%s4743_s0 + $0x4] ss:$12 sps:$4 sm:$0xff]   ;;  %v3731_v35 = vld [vmem:[%s4744_s1 + $0xec] ss:$16 sps:$4 sm:$0xff]  }
  0x42   :  { %784 = vmatprep.subr.bf16.mxu1 %v3707_v18  ;;  %v3700_v34 = vld [vmem:[%s4744_s1 + $0x120] ss:$16 sps:$4 sm:$0xff]   ;;  %v3704_v36 = vld [vmem:[%s4744_s1 + $0x144] ss:$16 sps:$4 sm:$0xff]   ;;  %724 = vmatprep.mubr.bf16.mxu0 %v3742_v33  ;;  %v3733_v37 = vld [vmem:[%s4744_s1 + $0xe8] ss:$16 sps:$4 sm:$0xff]  }
  0x43   :  { %810 = vmatprep.mubr.bf16.mxu1 %v3742_v33  ;;  %v3706_v38 = vld [vmem:[%s4744_s1 + $0x140] ss:$16 sps:$4 sm:$0xff]   ;;  %v3737_v39 = vld [vmem:[%s4744_s1 + $0x10c] ss:$16 sps:$4 sm:$0xff]   ;;  %v3710_v40 = vld [vmem:[%s4744_s1 + $0x164] ss:$16 sps:$4 sm:$0xff]  }
  0x44   :  { %699 = vmatpush1.bf16.msra.mxu0 %v3676_v7  ;;  %v3739_v41 = vld [vmem:[%s4744_s1 + $0x108] ss:$16 sps:$4 sm:$0xff]   ;;  %v3712_v42 = vld [vmem:[%s4744_s1 + $0x160] ss:$16 sps:$4 sm:$0xff]   ;;  %v3746_v43 = vld [vmem:[%s4744_s1 + $0x12c] ss:$16 sps:$4 sm:$0xff]  }
  0x45   :  { %700 = vmatprep.subr.bf16.mxu0 %v3677_v10  ;;  %785 = vmatpush1.bf16.msra.mxu1 %v3709_v20  ;;  %v3716_v44 = vld [vmem:[%s4744_s1 + $0x184] ss:$16 sps:$4 sm:$0xff]   ;;  %v3748_v45 = vld [vmem:[%s4744_s1 + $0x128] ss:$16 sps:$4 sm:$0xff]   ;;  %v3718_v46 = vld [vmem:[%s4744_s1 + $0x180] ss:$16 sps:$4 sm:$0xff]  }
  0x46   :  { %786 = vmatprep.subr.bf16.mxu1 %v3713_v22  ;;  %v3752_v47 = vld [vmem:[%s4744_s1 + $0x14c] ss:$16 sps:$4 sm:$0xff]   ;;  %v3722_v48 = vld [vmem:[%s4744_s1 + $0x1a4] ss:$16 sps:$4 sm:$0xff]   ;;  %v3754_v49 = vld [vmem:[%s4744_s1 + $0x148] ss:$16 sps:$4 sm:$0xff]  }
  0x47   :  { %v3724_v50 = vld [vmem:[%s4744_s1 + $0x1a0] ss:$16 sps:$4 sm:$0xff]   ;;  %v3758_v51 = vld [vmem:[%s4744_s1 + $0x16c] ss:$16 sps:$4 sm:$0xff]   ;;  %v3728_v52 = vld [vmem:[%s4744_s1 + $0x1c4] ss:$16 sps:$4 sm:$0xff]  }
  0x48   :  { %701 = vmatpush1.bf16.msra.mxu0 %v3679_v13  ;;  %v3760_v53 = vld [vmem:[%s4744_s1 + $0x168] ss:$16 sps:$4 sm:$0xff]   ;;  %v3730_v54 = vld [vmem:[%s4744_s1 + $0x1c0] ss:$16 sps:$4 sm:$0xff]   ;;  %v3764_v55 = vld [vmem:[%s4744_s1 + $0x18c] ss:$16 sps:$4 sm:$0xff]  }
  0x49   :  { %702 = vmatprep.subr.bf16.mxu0 %v3680_v14  ;;  %787 = vmatpush1.bf16.msra.mxu1 %v3715_v24  ;;  %v3734_v56 = vld [vmem:[%s4744_s1 + $0x1e4] ss:$16 sps:$4 sm:$0xff]   ;;  %v3766_v57 = vld [vmem:[%s4744_s1 + $0x188] ss:$16 sps:$4 sm:$0xff]   ;;  %v3736_v58 = vld [vmem:[%s4744_s1 + $0x1e0] ss:$16 sps:$4 sm:$0xff]  }
  0x4a   :  { %788 = vmatprep.subr.bf16.mxu1 %v3719_v26  ;;  %v3770_v59 = vld [vmem:[%s4744_s1 + $0x1ac] ss:$16 sps:$4 sm:$0xff]   ;;  %v3745_v60 = vld [vmem:[%s4744_s1 + $0x204] ss:$16 sps:$4 sm:$0xff]   ;;  %v3772_v62 = vld [vmem:[%s4744_s1 + $0x1a8] ss:$16 sps:$4 sm:$0xff]  }
  0x4b   :  { %v3740_v61 = vld [vmem:[%s4743_s0] ss:$12 sps:$4 sm:$0xff]   ;;  %v3751_v1 = vld [vmem:[%s4744_s1 + $0x224] ss:$16 sps:$4 sm:$0xff]   ;;  %v3778_v2 = vld [vmem:[%s4744_s1 + $0x1c8] ss:$16 sps:$4 sm:$0xff]  }
  0x4c   :  { %703 = vmatpush1.bf16.msra.mxu0 %v3682_v17  ;;  %v3743_v63 = vld [vmem:[%s4744_s1 + $0x200] ss:$16 sps:$4 sm:$0xff]   ;;  %v3776_v0 = vld [vmem:[%s4744_s1 + $0x1cc] ss:$16 sps:$4 sm:$0xff]   ;;  %v3757_v5 = vld [vmem:[%s4744_s1 + $0x244] ss:$16 sps:$4 sm:$0xff]  }
  0x4d   :  { %704 = vmatprep.subr.bf16.mxu0 %v3683_v19  ;;  %789 = vmatpush1.bf16.msra.mxu1 %v3721_v28  ;;  %v3749_v3 = vld [vmem:[%s4744_s1 + $0x220] ss:$16 sps:$4 sm:$0xff]   ;;  %v3782_v4 = vld [vmem:[%s4744_s1 + $0x1ec] ss:$16 sps:$4 sm:$0xff]   ;;  %v4306_v6 = vmov 0  }
  0x4e   :  { %790 = vmatprep.subr.bf16.mxu1 %v3725_v30  ;;  %v3784_v7 = vld [vmem:[%s4744_s1 + $0x1e8] ss:$16 sps:$4 sm:$0xff]   ;;  %v3755_v8 = vld [vmem:[%s4744_s1 + $0x240] ss:$16 sps:$4 sm:$0xff]   ;;  %v3790_v9 = vld [vmem:[%s4744_s1 + $0x20c] ss:$16 sps:$4 sm:$0xff]  }
  0x4f   :  { %v3763_v10 = vld [vmem:[%s4744_s1 + $0x264] ss:$16 sps:$4 sm:$0xff]   ;;  %v3788_v11 = vld [vmem:[%s4744_s1 + $0x208] ss:$16 sps:$4 sm:$0xff]   ;;  %v3761_v12 = vld [vmem:[%s4744_s1 + $0x260] ss:$16 sps:$4 sm:$0xff]  }
  0x50   :  { %705 = vmatpush1.bf16.msra.mxu0 %v3685_v21  ;;  %v3794_v13 = vld [vmem:[%s4744_s1 + $0x22c] ss:$16 sps:$4 sm:$0xff]   ;;  %v3769_v14 = vld [vmem:[%s4744_s1 + $0x284] ss:$16 sps:$4 sm:$0xff]   ;;  %v3792_v15 = vld [vmem:[%s4744_s1 + $0x228] ss:$16 sps:$4 sm:$0xff]  }
  0x51   :  { %706 = vmatprep.subr.bf16.mxu0 %v3686_v23  ;;  %791 = vmatpush1.bf16.msra.mxu1 %v3727_v32  ;;  %v3767_v16 = vld [vmem:[%s4744_s1 + $0x280] ss:$16 sps:$4 sm:$0xff]   ;;  %v3797_v17 = vld [vmem:[%s4744_s1 + $0x24c] ss:$16 sps:$4 sm:$0xff]   ;;  %v3775_v18 = vld [vmem:[%s4744_s1 + $0x2a4] ss:$16 sps:$4 sm:$0xff]  }
  0x52   :  { %792 = vmatprep.subr.bf16.mxu1 %v3731_v35  ;;  %v3795_v19 = vld [vmem:[%s4744_s1 + $0x248] ss:$16 sps:$4 sm:$0xff]   ;;  %v3773_v20 = vld [vmem:[%s4744_s1 + $0x2a0] ss:$16 sps:$4 sm:$0xff]   ;;  %v3800_v21 = vld [vmem:[%s4744_s1 + $0x26c] ss:$16 sps:$4 sm:$0xff]  }
  0x53   :  { %v3781_v22 = vld [vmem:[%s4744_s1 + $0x2c4] ss:$16 sps:$4 sm:$0xff]   ;;  %v3798_v23 = vld [vmem:[%s4744_s1 + $0x268] ss:$16 sps:$4 sm:$0xff]   ;;  %v3779_v24 = vld [vmem:[%s4744_s1 + $0x2c0] ss:$16 sps:$4 sm:$0xff]  }
  0x54   :  { %707 = vmatpush1.bf16.msra.mxu0 %v3688_v25  ;;  %v3803_v25 = vld [vmem:[%s4744_s1 + $0x28c] ss:$16 sps:$4 sm:$0xff]   ;;  %v3787_v26 = vld [vmem:[%s4744_s1 + $0x2e4] ss:$16 sps:$4 sm:$0xff]   ;;  %v3785_v28 = vld [vmem:[%s4744_s1 + $0x2e0] ss:$16 sps:$4 sm:$0xff]  }
  0x55   :  { %708 = vmatprep.subr.bf16.mxu0 %v3692_v27  ;;  %793 = vmatpush1.bf16.msra.mxu1 %v3733_v37  ;;  %v3801_v27 = vld [vmem:[%s4744_s1 + $0x288] ss:$16 sps:$4 sm:$0xff]   ;;  %v3815_v30 = vld [vmem:[#allocation2 + $0x4] ss:$16 sps:$4 sm:$0xff]   ;;  %v3809_v33 = vld [vmem:[%s4744_s1 + $0x2cc] ss:$16 sps:$4 sm:$0xff]  }
  0x56   :  { %794 = vmatprep.subr.bf16.mxu1 %v3737_v39  ;;  %v3804_v32 = vld [vmem:[%s4744_s1 + $0x2a8] ss:$16 sps:$4 sm:$0xff]   ;;  %v3821_v35 = vld [vmem:[#allocation2 + $0x24] ss:$16 sps:$4 sm:$0xff]   ;;  %v3812_v37 = vld [vmem:[%s4744_s1 + $0x2ec] ss:$16 sps:$4 sm:$0xff]  }
  0x57   :  { %v3827_v39 = vld [vmem:[#allocation2 + $0x44] ss:$16 sps:$4 sm:$0xff]  }
  0x58   :  { %709 = vmatpush1.bf16.msra.mxu0 %v3694_v29  ;;  %v3806_v29 = vld [vmem:[%s4744_s1 + $0x2ac] ss:$16 sps:$4 sm:$0xff]  }
  0x59   :  { %710 = vmatprep.subr.bf16.mxu0 %v3698_v31  ;;  %795 = vmatpush1.bf16.msra.mxu1 %v3739_v41  ;;  %v3791_v31 = vld [vmem:[%s4743_s0 + $0x8] ss:$12 sps:$4 sm:$0xff]   ;;  %v3818_v41 = vld [vmem:[#allocation2 + $0xc] ss:$16 sps:$4 sm:$0xff]  }
  0x5a   :  { %796 = vmatprep.subr.bf16.mxu1 %v3746_v43  ;;  %v3833_v43 = vld [vmem:[#allocation2 + $0x64] ss:$16 sps:$4 sm:$0xff]  }
  0x5c   :  { %711 = vmatpush1.bf16.msra.mxu0 %v3700_v34  ;;  %v3813_v34 = vld [vmem:[#allocation2] ss:$16 sps:$4 sm:$0xff]  }
  0x5d   :  { %712 = vmatprep.subr.bf16.mxu0 %v3704_v36  ;;  %797 = vmatpush1.bf16.msra.mxu1 %v3748_v45  ;;  %v3807_v36 = vld [vmem:[%s4744_s1 + $0x2c8] ss:$16 sps:$4 sm:$0xff]   ;;  %v3824_v45 = vld [vmem:[#allocation2 + $0x2c] ss:$16 sps:$4 sm:$0xff]  }
  0x5e   :  { %798 = vmatprep.subr.bf16.mxu1 %v3752_v47  ;;  %v3839_v47 = vld [vmem:[#allocation2 + $0x84] ss:$16 sps:$4 sm:$0xff]  }
  0x60   :  { %713 = vmatpush1.bf16.msra.mxu0 %v3706_v38  ;;  %v3819_v38 = vld [vmem:[#allocation2 + $0x20] ss:$16 sps:$4 sm:$0xff]  }
  0x61   :  { %714 = vmatprep.subr.bf16.mxu0 %v3710_v40  ;;  %799 = vmatpush1.bf16.msra.mxu1 %v3754_v49  ;;  %v3810_v40 = vld [vmem:[%s4744_s1 + $0x2e8] ss:$16 sps:$4 sm:$0xff]   ;;  %v3830_v49 = vld [vmem:[#allocation2 + $0x4c] ss:$16 sps:$4 sm:$0xff]  }
  0x62   :  { %800 = vmatprep.subr.bf16.mxu1 %v3758_v51  ;;  %v3845_v51 = vld [vmem:[#allocation2 + $0xa4] ss:$16 sps:$4 sm:$0xff]  }
  0x64   :  { %715 = vmatpush1.bf16.msra.mxu0 %v3712_v42  ;;  %v3825_v42 = vld [vmem:[#allocation2 + $0x40] ss:$16 sps:$4 sm:$0xff]  }
  0x65   :  { %716 = vmatprep.subr.bf16.mxu0 %v3716_v44  ;;  %801 = vmatpush1.bf16.msra.mxu1 %v3760_v53  ;;  %v3816_v44 = vld [vmem:[#allocation2 + $0x8] ss:$16 sps:$4 sm:$0xff]   ;;  %v3836_v53 = vld [vmem:[#allocation2 + $0x6c] ss:$16 sps:$4 sm:$0xff]  }
  0x66   :  { %802 = vmatprep.subr.bf16.mxu1 %v3764_v55  ;;  %v3851_v55 = vld [vmem:[#allocation2 + $0xc4] ss:$16 sps:$4 sm:$0xff]  }
  0x68   :  { %717 = vmatpush1.bf16.msra.mxu0 %v3718_v46  ;;  %v3831_v46 = vld [vmem:[#allocation2 + $0x60] ss:$16 sps:$4 sm:$0xff]  }
  0x69   :  { %718 = vmatprep.subr.bf16.mxu0 %v3722_v48  ;;  %803 = vmatpush1.bf16.msra.mxu1 %v3766_v57  ;;  %v3822_v48 = vld [vmem:[#allocation2 + $0x28] ss:$16 sps:$4 sm:$0xff]   ;;  %v3842_v57 = vld [vmem:[#allocation2 + $0x8c] ss:$16 sps:$4 sm:$0xff]  }
  0x6a   :  { %804 = vmatprep.subr.bf16.mxu1 %v3770_v59  ;;  %v3857_v59 = vld [vmem:[#allocation2 + $0xe4] ss:$16 sps:$4 sm:$0xff]  }
  0x6c   :  { %719 = vmatpush1.bf16.msra.mxu0 %v3724_v50  ;;  %v3837_v50 = vld [vmem:[#allocation2 + $0x80] ss:$16 sps:$4 sm:$0xff]  }
  0x6d   :  { %720 = vmatprep.subr.bf16.mxu0 %v3728_v52  ;;  %805 = vmatpush1.bf16.msra.mxu1 %v3772_v62  ;;  %v3828_v52 = vld [vmem:[#allocation2 + $0x48] ss:$16 sps:$4 sm:$0xff]   ;;  %v3855_v62 = vld [vmem:[#allocation2 + $0xe0] ss:$16 sps:$4 sm:$0xff]  }
  0x6e   :  { %806 = vmatprep.subr.bf16.mxu1 %v3776_v0  ;;  %v3846_v0 = vld [vmem:[#allocation2 + $0xa8] ss:$16 sps:$4 sm:$0xff]  }
  0x70   :  { %721 = vmatpush1.bf16.msra.mxu0 %v3730_v54  ;;  %v3843_v54 = vld [vmem:[#allocation2 + $0xa0] ss:$16 sps:$4 sm:$0xff]  }
  0x71   :  { %722 = vmatprep.subr.bf16.mxu0 %v3734_v56  ;;  %807 = vmatpush1.bf16.msra.mxu1 %v3778_v2  ;;  %v3834_v56 = vld [vmem:[#allocation2 + $0x68] ss:$16 sps:$4 sm:$0xff]   ;;  %v3861_v2 = vld [vmem:[#allocation2 + $0x100] ss:$16 sps:$4 sm:$0xff]  }
  0x72   :  { %808 = vmatprep.subr.bf16.mxu1 %v3782_v4  ;;  %v3852_v4 = vld [vmem:[#allocation2 + $0xc8] ss:$16 sps:$4 sm:$0xff]  }
  0x74   :  { %723 = vmatpush1.bf16.msra.mxu0 %v3736_v58  ;;  %v3849_v58 = vld [vmem:[#allocation2 + $0xc0] ss:$16 sps:$4 sm:$0xff]  }
  0x75   :  { %735 = vmatprep.subr.bf16.mxu0 %v3745_v60  ;;  %809 = vmatpush1.bf16.msra.mxu1 %v3784_v7  ;;  %v3840_v60 = vld [vmem:[#allocation2 + $0x88] ss:$16 sps:$4 sm:$0xff]   ;;  %v3875_v7 = vld [vmem:[#allocation2 + $0x144] ss:$16 sps:$4 sm:$0xff]  }
  0x76   :  { %821 = vmatprep.subr.bf16.mxu1 %v3790_v9  ;;  %v3866_v9 = vld [vmem:[#allocation2 + $0x10c] ss:$16 sps:$4 sm:$0xff]  }
  0x77   :  { %725 = vmatmul.mubr.bf16.vlgmr.msra.gmra.mrb[0].mxu0 %v3740_v61 }
  0x78   :  { %736 = vmatpush1.bf16.msra.mxu0 %v3743_v63  ;;  %767 = vmatprep.mubr.bf16.mxu0 %v4306_v6  ;;  %v3863_v63 = vld [vmem:[#allocation2 + $0x104] ss:$16 sps:$4 sm:$0xff]  }
  0x79   :  { %737 = vmatprep.subr.bf16.mxu0 %v3751_v1  ;;  %811 = vmatmul.mubr.bf16.vlgmr.msra.gmra.mrb[0].mxu1 %v3740_v61  ;;  %v3848_v61 = vld [vmem:[#allocation2 + $0xac] ss:$16 sps:$4 sm:$0xff]  }
  0x7a   :  { %822 = vmatpush1.bf16.msra.mxu1 %v3788_v11  ;;  %853 = vmatprep.mubr.bf16.mxu1 %v4306_v6  ;;  %v3854_v1 = vld [vmem:[#allocation2 + $0xcc] ss:$16 sps:$4 sm:$0xff]   ;;  %v3867_v6 = vld [vmem:[#allocation2 + $0x120] ss:$16 sps:$4 sm:$0xff]   ;;  %v3881_v11 = vld [vmem:[#allocation2 + $0x164] ss:$16 sps:$4 sm:$0xff]  }
  0x7b   :  { %823 = vmatprep.subr.bf16.mxu1 %v3794_v13  ;;  %v3872_v13 = vld [vmem:[#allocation2 + $0x12c] ss:$16 sps:$4 sm:$0xff]  }
  0x7c   :  { %738 = vmatpush1.bf16.msra.mxu0 %v3749_v3  ;;  %v3869_v3 = vld [vmem:[#allocation2 + $0x124] ss:$16 sps:$4 sm:$0xff]  }
  0x7d   :  { %739 = vmatprep.subr.bf16.mxu0 %v3757_v5  ;;  %v3860_v5 = vld [vmem:[#allocation2 + $0xec] ss:$16 sps:$4 sm:$0xff]  }
  0x7e   :  { %824 = vmatpush1.bf16.msra.mxu1 %v3792_v15  ;;  %v3887_v15 = vld [vmem:[#allocation2 + $0x184] ss:$16 sps:$4 sm:$0xff]  }
  0x7f   :  { %825 = vmatprep.subr.bf16.mxu1 %v3797_v17  ;;  %v3878_v17 = vld [vmem:[#allocation2 + $0x14c] ss:$16 sps:$4 sm:$0xff]  }
  0x80   :  { %740 = vmatpush1.bf16.msra.mxu0 %v3755_v8  ;;  %v3858_v8 = vld [vmem:[#allocation2 + $0xe8] ss:$16 sps:$4 sm:$0xff]  }
  0x81   :  { %741 = vmatprep.subr.bf16.mxu0 %v3763_v10  ;;  %v3873_v10 = vld [vmem:[#allocation2 + $0x140] ss:$16 sps:$4 sm:$0xff]  }
  0x82   :  { %826 = vmatpush1.bf16.msra.mxu1 %v3795_v19  ;;  %v3893_v19 = vld [vmem:[#allocation2 + $0x1a4] ss:$16 sps:$4 sm:$0xff]  }
  0x83   :  { %827 = vmatprep.subr.bf16.mxu1 %v3800_v21  ;;  %v3884_v21 = vld [vmem:[#allocation2 + $0x16c] ss:$16 sps:$4 sm:$0xff]  }
  0x84   :  { %742 = vmatpush1.bf16.msra.mxu0 %v3761_v12  ;;  %v3864_v12 = vld [vmem:[#allocation2 + $0x108] ss:$16 sps:$4 sm:$0xff]  }
  0x85   :  { %743 = vmatprep.subr.bf16.mxu0 %v3769_v14  ;;  %v3879_v14 = vld [vmem:[#allocation2 + $0x160] ss:$16 sps:$4 sm:$0xff]  }
  0x86   :  { %828 = vmatpush1.bf16.msra.mxu1 %v3798_v23  ;;  %v3882_v23 = vld [vmem:[#allocation2 + $0x168] ss:$16 sps:$4 sm:$0xff]  }
  0x87   :  { %829 = vmatprep.subr.bf16.mxu1 %v3803_v25  ;;  %v3888_v25 = vld [vmem:[#allocation2 + $0x188] ss:$16 sps:$4 sm:$0xff]  }
  0x88   :  { %744 = vmatpush1.bf16.msra.mxu0 %v3767_v16  ;;  %v3870_v16 = vld [vmem:[#allocation2 + $0x128] ss:$16 sps:$4 sm:$0xff]  }
  0x89   :  { %745 = vmatprep.subr.bf16.mxu0 %v3775_v18  ;;  %v3885_v18 = vld [vmem:[#allocation2 + $0x180] ss:$16 sps:$4 sm:$0xff]  }
  0x8a   :  { %830 = vmatpush1.bf16.msra.mxu1 %v3801_v27  ;;  %v3894_v27 = vld [vmem:[#allocation2 + $0x1a8] ss:$16 sps:$4 sm:$0xff]  }
  0x8b   :  { %831 = vmatprep.subr.bf16.mxu1 %v3806_v29  ;;  %v3902_v29 = vld [vmem:[#allocation2 + $0x1cc] ss:$16 sps:$4 sm:$0xff]  }
  0x8c   :  { %746 = vmatpush1.bf16.msra.mxu0 %v3773_v20  ;;  %v3876_v20 = vld [vmem:[#allocation2 + $0x148] ss:$16 sps:$4 sm:$0xff]  }
  0x8d   :  { %747 = vmatprep.subr.bf16.mxu0 %v3781_v22  ;;  %v3891_v22 = vld [vmem:[#allocation2 + $0x1a0] ss:$16 sps:$4 sm:$0xff]  }
  0x8e   :  { %832 = vmatpush1.bf16.msra.mxu1 %v3804_v32  ;;  %v3905_v32 = vld [vmem:[#allocation2 + $0x1e4] ss:$16 sps:$4 sm:$0xff]  }
  0x8f   :  { %833 = vmatprep.subr.bf16.mxu1 %v3809_v33  ;;  %v3908_v33 = vld [vmem:[#allocation2 + $0x1ec] ss:$16 sps:$4 sm:$0xff]  }
  0x90   :  { %748 = vmatpush1.bf16.msra.mxu0 %v3779_v24  ;;  %v3890_v24 = vld [vmem:[#allocation2 + $0x18c] ss:$16 sps:$4 sm:$0xff]  }
  0x91   :  { %749 = vmatprep.subr.bf16.mxu0 %v3787_v26  ;;  %v3896_v26 = vld [vmem:[#allocation2 + $0x1ac] ss:$16 sps:$4 sm:$0xff]  }
  0x92   :  { %834 = vmatpush1.bf16.msra.mxu1 %v3807_v36  ;;  %v3911_v36 = vld [vmem:[#allocation2 + $0x204] ss:$16 sps:$4 sm:$0xff]  }
  0x93   :  { %835 = vmatprep.subr.bf16.mxu1 %v3812_v37  ;;  %v3914_v37 = vld [vmem:[#allocation2 + $0x20c] ss:$16 sps:$4 sm:$0xff]  }
  0x94   :  { %750 = vmatpush1.bf16.msra.mxu0 %v3785_v28  ;;  %v3899_v28 = vld [vmem:[#allocation2 + $0x1c4] ss:$16 sps:$4 sm:$0xff]  }
  0x95   :  { %1666 = vmatprep.subr.bf16.mxu0 %v3815_v30  ;;  %v3897_v30 = vld [vmem:[#allocation2 + $0x1c0] ss:$16 sps:$4 sm:$0xff]  }
  0x96   :  { %836 = vmatpush1.bf16.msra.mxu1 %v3810_v40 }
  0x97   :  { %768 = vmatmul.mubr.bf16.vlgmr.msra.gmra.mrb[0].mxu0 %v3791_v31  ;;  %1752 = vmatprep.subr.bf16.mxu1 %v3818_v41  ;;  %v174_v41 = vld [vmem:[%s4745_s2] sm:$0xf] }
  0x98   :  { %1667 = vmatpush1.bf16.msra.mxu0 %v3813_v34  ;;  %v3903_v34 = vld [vmem:[#allocation2 + $0x1e0] ss:$16 sps:$4 sm:$0xff]  }
  0x99   :  { %1668 = vmatprep.subr.bf16.mxu0 %v3821_v35  ;;  %854 = vmatmul.mubr.bf16.vlgmr.msra.gmra.mrb[0].mxu1 %v3791_v31  ;;  %v3900_v31 = vld [vmem:[#allocation2 + $0x1c8] ss:$16 sps:$4 sm:$0xff]  }
  0x9a   :  { %1753 = vmatpush1.bf16.msra.mxu1 %v3816_v44  ;;  %v3906_v35 = vld [vmem:[#allocation2 + $0x1e8] ss:$16 sps:$4 sm:$0xff]  }
  0x9b   :  { %1754 = vmatprep.subr.bf16.mxu1 %v3824_v45 }
  0x9c   :  { %1669 = vmatpush1.bf16.msra.mxu0 %v3819_v38  ;;  %v176_v38 = vlaneseq }
  0x9d   :  { %1670 = vmatprep.subr.bf16.mxu0 %v3827_v39 }
  0x9e   :  { %1755 = vmatpush1.bf16.msra.mxu1 %v3822_v48  ;;  %v177_v39 = vshrl.u32 %v176_v38, 7  ;;  %v3948_v38 = vld [vmem:[#allocation2 + $0x2c8] ss:$16 sps:$4 sm:$0xff]  }
  0x9f   :  { %1756 = vmatprep.subr.bf16.mxu1 %v3830_v49 }
  0xa0   :  { %1671 = vmatpush1.bf16.msra.mxu0 %v3825_v42  ;;  %v4697_v40 = vsub.s32 0, %v177_v39  ;;  %v4702_v42 = vsub.s32 1, %v177_v39 }
  0xa1   :  { %1672 = vmatprep.subr.bf16.mxu0 %v3833_v43 }
  0xa2   :  { %1757 = vmatpush1.bf16.msra.mxu1 %v3828_v52  ;;  %v179_v43 = vrot.slane %v174_v41, %v4697_v40  ;;  %v183_v44 = vrot.slane %v174_v41, %v4702_v42 }
  0xa3   :  { %1758 = vmatprep.subr.bf16.mxu1 %v3836_v53  ;;  %v4706_v53 = vsub.s32 2, %v177_v39 }
  0xa4   :  { %1673 = vmatpush1.bf16.msra.mxu0 %v3831_v46 }
  0xa5   :  { %1674 = vmatprep.subr.bf16.mxu0 %v3839_v47 }
  0xa6   :  { %1759 = vmatpush1.bf16.msra.mxu1 %v3834_v56  ;;  %v4708_v56 = vsub.s32 3, %v177_v39  ;;  %v3953_v39 = vld [vmem:[#allocation2 + $0x2e4] ss:$16 sps:$4 sm:$0xff]  }
  0xa7   :  { %1760 = vmatprep.subr.bf16.mxu1 %v3842_v57 }
  0xa8   :  { %1675 = vmatpush1.bf16.msra.mxu0 %v3837_v50 }
  0xa9   :  { %1676 = vmatprep.subr.bf16.mxu0 %v3845_v51 }
  0xaa   :  { %1761 = vmatpush1.bf16.msra.mxu1 %v3840_v60 }
  0xab   :  { %1762 = vmatprep.subr.bf16.mxu1 %v3848_v61  ;;  %v3909_v61 = vld [vmem:[#allocation2 + $0x200] ss:$16 sps:$4 sm:$0xff]  }
  0xac   :  { %1677 = vmatpush1.bf16.msra.mxu0 %v3843_v54 }
  0xad   :  { %1678 = vmatprep.subr.bf16.mxu0 %v3851_v55 }
  0xae   :  { %1763 = vmatpush1.bf16.msra.mxu1 %v3846_v0  ;;  %v3917_v0 = vld [vmem:[#allocation2 + $0x224] ss:$16 sps:$4 sm:$0xff]  }
  0xaf   :  { %1764 = vmatprep.subr.bf16.mxu1 %v3854_v1  ;;  %v3920_v1 = vld [vmem:[#allocation2 + $0x22c] ss:$16 sps:$4 sm:$0xff]  }
  0xb0   :  { %1679 = vmatpush1.bf16.msra.mxu0 %v3849_v58 }
  0xb1   :  { %1680 = vmatprep.subr.bf16.mxu0 %v3857_v59 }
  0xb2   :  { %1765 = vmatpush1.bf16.msra.mxu1 %v3852_v4  ;;  %v3915_v4 = vld [vmem:[#allocation2 + $0x220] ss:$16 sps:$4 sm:$0xff]  }
  0xb3   :  { %1766 = vmatprep.subr.bf16.mxu1 %v3860_v5  ;;  %v3918_v5 = vld [vmem:[#allocation2 + $0x228] ss:$16 sps:$4 sm:$0xff]  }
  0xb4   :  { %1681 = vmatpush1.bf16.msra.mxu0 %v3855_v62  ;;  %v3912_v62 = vld [vmem:[#allocation2 + $0x208] ss:$16 sps:$4 sm:$0xff]  }
  0xb5   :  { %1682 = vmatprep.subr.bf16.mxu0 %v3863_v63  ;;  %v187_v63 = vrot.slane %v174_v41, %v4706_v53 }
  0xb6   :  { %1767 = vmatpush1.bf16.msra.mxu1 %v3858_v8  ;;  %v3923_v8 = vld [vmem:[#allocation2 + $0x244] ss:$16 sps:$4 sm:$0xff]  }
  0xb7   :  { %1768 = vmatprep.subr.bf16.mxu1 %v3866_v9  ;;  %v3926_v9 = vld [vmem:[#allocation2 + $0x24c] ss:$16 sps:$4 sm:$0xff]  }
  0xb8   :  { %1683 = vmatpush1.bf16.msra.mxu0 %v3861_v2  ;;  %v191_v2 = vrot.slane %v174_v41, %v4708_v56  ;;  %v3956_v41 = vld [vmem:[#allocation2 + $0x2ec] ss:$16 sps:$4 sm:$0xff]  }
  0xb9   :  { %1684 = vmatprep.subr.bf16.mxu0 %v3869_v3 }
  0xba   :  { %1769 = vmatpush1.bf16.msra.mxu1 %v3864_v12 }
  0xbb   :  { %1770 = vmatprep.subr.bf16.mxu1 %v3872_v13 }
  0xbc   :  { %1685 = vmatpush1.bf16.msra.mxu0 %v3867_v6 }
  0xbd   :  { %1686 = vmatprep.subr.bf16.mxu0 %v3875_v7 }
  0xbe   :  { %1771 = vmatpush1.bf16.msra.mxu1 %v3870_v16 }
  0xbf   :  { %1772 = vmatprep.subr.bf16.mxu1 %v3878_v17  ;;  %v3921_v17 = vld [vmem:[#allocation2 + $0x240] ss:$16 sps:$4 sm:$0xff]  }
  0xc0   :  { %1687 = vmatpush1.bf16.msra.mxu0 %v3873_v10 }
  0xc1   :  { %1688 = vmatprep.subr.bf16.mxu0 %v3881_v11 }
  0xc2   :  { %1773 = vmatpush1.bf16.msra.mxu1 %v3876_v20  ;;  %v3929_v20 = vld [vmem:[#allocation2 + $0x264] ss:$16 sps:$4 sm:$0xff]  }
  0xc3   :  { %1774 = vmatprep.subr.bf16.mxu1 %v3884_v21  ;;  %v3932_v21 = vld [vmem:[#allocation2 + $0x26c] ss:$16 sps:$4 sm:$0xff]  }
  0xc4   :  { %1689 = vmatpush1.bf16.msra.mxu0 %v3879_v14 }
  0xc5   :  { %1690 = vmatprep.subr.bf16.mxu0 %v3887_v15 }
  0xc6   :  { %1775 = vmatpush1.bf16.msra.mxu1 %v3882_v23 }
  0xc7   :  { %1776 = vmatprep.subr.bf16.mxu1 %v3890_v24 }
  0xc8   :  { %1691 = vmatpush1.bf16.msra.mxu0 %v3885_v18  ;;  %v3924_v18 = vld [vmem:[#allocation2 + $0x248] ss:$16 sps:$4 sm:$0xff]  }
  0xc9   :  { %1692 = vmatprep.subr.bf16.mxu0 %v3893_v19 }
  0xca   :  { %1777 = vmatpush1.bf16.msra.mxu1 %v3888_v25  ;;  %v3927_v25 = vld [vmem:[#allocation2 + $0x260] ss:$16 sps:$4 sm:$0xff]  }
  0xcb   :  { %1778 = vmatprep.subr.bf16.mxu1 %v3896_v26  ;;  %v3930_v26 = vld [vmem:[#allocation2 + $0x268] ss:$16 sps:$4 sm:$0xff]  }
  0xcc   :  { %1693 = vmatpush1.bf16.msra.mxu0 %v3891_v22 }
  0xcd   :  { %1694 = vmatprep.subr.bf16.mxu0 %v3899_v28  ;;  %v3938_v28 = vld [vmem:[#allocation2 + $0x28c] ss:$16 sps:$4 sm:$0xff]  }
  0xce   :  { %1779 = vmatpush1.bf16.msra.mxu1 %v3894_v27  ;;  %v3935_v27 = vld [vmem:[#allocation2 + $0x284] ss:$16 sps:$4 sm:$0xff]  }
  0xcf   :  { %1780 = vmatprep.subr.bf16.mxu1 %v3902_v29  ;;  %v3933_v29 = vld [vmem:[#allocation2 + $0x280] ss:$16 sps:$4 sm:$0xff]  }
  0xd0   :  { %1695 = vmatpush1.bf16.msra.mxu0 %v3897_v30  ;;  %v3936_v30 = vld [vmem:[#allocation2 + $0x288] ss:$16 sps:$4 sm:$0xff]  }
  0xd1   :  { %1696 = vmatprep.subr.bf16.mxu0 %v3905_v32  ;;  %v3944_v32 = vld [vmem:[#allocation2 + $0x2ac] ss:$16 sps:$4 sm:$0xff]  }
  0xd2   :  { %1781 = vmatpush1.bf16.msra.mxu1 %v3900_v31  ;;  %v3941_v31 = vld [vmem:[#allocation2 + $0x2a4] ss:$16 sps:$4 sm:$0xff]  }
  0xd3   :  { %1782 = vmatprep.subr.bf16.mxu1 %v3908_v33  ;;  %v3939_v33 = vld [vmem:[#allocation2 + $0x2a0] ss:$16 sps:$4 sm:$0xff]  }
  0xd4   :  { %1697 = vmatpush1.bf16.msra.mxu0 %v3903_v34  ;;  %v3942_v34 = vld [vmem:[#allocation2 + $0x2a8] ss:$16 sps:$4 sm:$0xff]  }
  0xd5   :  { %1709 = vmatprep.subr.bf16.mxu0 %v3911_v36  ;;  %v3950_v36 = vld [vmem:[#allocation2 + $0x2cc] ss:$16 sps:$4 sm:$0xff]  }
  0xd6   :  { %1783 = vmatpush1.bf16.msra.mxu1 %v3906_v35  ;;  %v3947_v35 = vld [vmem:[#allocation2 + $0x2c4] ss:$16 sps:$4 sm:$0xff]  }
  0xd7   :  { %1795 = vmatprep.subr.bf16.mxu1 %v3914_v37  ;;  %v3945_v37 = vld [vmem:[#allocation2 + $0x2c0] ss:$16 sps:$4 sm:$0xff]  }
 0x16a   :  { %v769_v45 = vpop.f32.mrb[0].mxu0 }
 0x16b   :  { %v3609_v46 = vadd.f32 %v769_v45, %v179_v43  ;;  %v771_v47 = vpop.f32.mrb[1].mxu0  ;;  %v3959_v45 = vld [vmem:[#allocation2 + $0x304] ss:$16 sps:$4 sm:$0xff]  }
 0x16c   :  { %v3610_v48 = vadd.f32 %v771_v47, %v183_v44  ;;  %v773_v49 = vpop.f32.mrb[2].mxu0  ;;  %v855_v3 = vpop.f32.mrb[0].mxu1  ;;  %v3957_v47 = vld [vmem:[#allocation2 + $0x300] ss:$16 sps:$4 sm:$0xff]  }
 0x16d   :  { %v3611_v50 = vadd.f32 %v773_v49, %v179_v43  ;;  %v775_v51 = vpop.f32.mrb[3].mxu0  ;;  %v864_v54 = vmax.f32 %v3609_v46, 0.0  ;;  %v3613_v6 = vadd.f32 %v855_v3, %v187_v63  ;;  %v857_v7 = vpop.f32.mrb[1].mxu1  ;;  %v3951_v43 = vld [vmem:[#allocation2 + $0x2e0] ss:$16 sps:$4 sm:$0xff]  }
 0x16e   :  { %v3612_v52 = vadd.f32 %v775_v51, %v183_v44  ;;  %v865_v57 = vmax.f32 %v3610_v48, 0.0  ;;  %v3614_v10 = vadd.f32 %v857_v7, %v191_v2  ;;  %v859_v11 = vpop.f32.mrb[2].mxu1  ;;  %v3954_v44 = vld [vmem:[#allocation2 + $0x2e8] ss:$16 sps:$4 sm:$0xff]   ;;  %v3962_v46 = vld [vmem:[#allocation2 + $0x30c] ss:$16 sps:$4 sm:$0xff]  }
 0x16f   :  { %v868_v55 = vmax.f32 %v3611_v50, 0.0  ;;  %v866_v12 = vmax.f32 %v3613_v6, 0.0  ;;  %v3615_v13 = vadd.f32 %v859_v11, %v187_v63  ;;  %v861_v14 = vpop.f32.mrb[3].mxu1  ;;  %v3960_v48 = vld [vmem:[#allocation2 + $0x308] ss:$16 sps:$4 sm:$0xff]  }
 0x170   :  { %v869_v58 = vmax.f32 %v3612_v52, 0.0  ;;  %v867_v15 = vmax.f32 %v3614_v10, 0.0  ;;  %v3616_v16 = vadd.f32 %v861_v14, %v191_v2  ;;  %v3965_v49 = vld [vmem:[#allocation2 + $0x324] ss:$16 sps:$4 sm:$0xff]   ;;  %v3968_v50 = vld [vmem:[#allocation2 + $0x32c] ss:$16 sps:$4 sm:$0xff]  }
 0x171   :  { %v872_v59 = vpack.c.bf16 %v868_v55, %v864_v54  ;;  %v870_v19 = vmax.f32 %v3615_v13, 0.0  ;;  %v3963_v51 = vld [vmem:[#allocation2 + $0x320] ss:$16 sps:$4 sm:$0xff]   ;;  %v3966_v52 = vld [vmem:[#allocation2 + $0x328] ss:$16 sps:$4 sm:$0xff]  }
 0x172   :  { %v873_v60 = vpack.c.bf16 %v869_v58, %v865_v57  ;;  %v871_v22 = vmax.f32 %v3616_v16, 0.0  ;;  %v3971_v54 = vld [vmem:[#allocation2 + $0x344] ss:$16 sps:$4 sm:$0xff]   ;;  %v3974_v55 = vld [vmem:[#allocation2 + $0x34c] ss:$16 sps:$4 sm:$0xff]  }
 0x173   :  { %v4712_v23 = vpack.c.bf16 %v870_v19, %v866_v12  ;;  %v3969_v57 = vld [vmem:[#allocation2 + $0x340] ss:$16 sps:$4 sm:$0xff]   ;;  %v3972_v58 = vld [vmem:[#allocation2 + $0x348] ss:$16 sps:$4 sm:$0xff]   ;;  %v3983_v63 = vld [vmem:[#allocation2 + $0x384] ss:$16 sps:$4 sm:$0xff]  }
 0x174   :  { %1698 = vmatprep.mubr.bf16.mxu0 %v873_v60  ;;  %1784 = vmatprep.mubr.bf16.mxu1 %v873_v60  ;;  %v875_v24 = vpack.c.bf16 %v871_v22, %v867_v15  ;;  %v3980_v60 = vld [vmem:[#allocation2 + $0x36c] ss:$16 sps:$4 sm:$0xff]   ;;  %v3984_v2 = vld [vmem:[#allocation2 + $0x388] ss:$16 sps:$4 sm:$0xff]   ;;  %v3989_v3 = vld [vmem:[#allocation2 + $0x3a4] ss:$16 sps:$4 sm:$0xff]  }
 0x175   :  { %1699 = vmatmul.mubr.bf16.vlgmr.msra.gmra.mrb[4].mxu0 %v872_v59  ;;  %1785 = vmatmul.mubr.bf16.vlgmr.msra.gmra.mrb[4].mxu1 %v872_v59  ;;  %v3977_v59 = vld [vmem:[#allocation2 + $0x364] ss:$16 sps:$4 sm:$0xff]   ;;  %v3990_v6 = vld [vmem:[#allocation2 + $0x3a8] ss:$16 sps:$4 sm:$0xff]   ;;  %v4004_v12 = vld [vmem:[#allocation2 + $0x3ec] ss:$16 sps:$4 sm:$0xff]  }
 0x176   :  { %1710 = vmatpush1.bf16.msra.mxu0 %v3909_v61  ;;  %1796 = vmatpush1.bf16.msra.mxu1 %v3912_v62  ;;  %v3975_v61 = vld [vmem:[#allocation2 + $0x360] ss:$16 sps:$4 sm:$0xff]   ;;  %v3978_v62 = vld [vmem:[#allocation2 + $0x368] ss:$16 sps:$4 sm:$0xff]   ;;  %v3995_v7 = vld [vmem:[#allocation2 + $0x3c4] ss:$16 sps:$4 sm:$0xff]  }
 0x177   :  { %1711 = vmatprep.subr.bf16.mxu0 %v3917_v0  ;;  %1797 = vmatprep.subr.bf16.mxu1 %v3920_v1  ;;  %v3986_v0 = vld [vmem:[#allocation2 + $0x38c] ss:$16 sps:$4 sm:$0xff]   ;;  %v3981_v1 = vld [vmem:[#allocation2 + $0x380] ss:$16 sps:$4 sm:$0xff]   ;;  %v3996_v10 = vld [vmem:[#allocation2 + $0x3c8] ss:$16 sps:$4 sm:$0xff]  }
 0x178   :  { %1741 = vmatprep.mubr.bf16.mxu0 %v875_v24  ;;  %1827 = vmatprep.mubr.bf16.mxu1 %v875_v24  ;;  %v4001_v11 = vld [vmem:[#allocation2 + $0x3e4] ss:$16 sps:$4 sm:$0xff]   ;;  %v3999_v13 = vld [vmem:[#allocation2 + $0x3e0] ss:$16 sps:$4 sm:$0xff]   ;;  %v4002_v14 = vld [vmem:[#allocation2 + $0x3e8] ss:$16 sps:$4 sm:$0xff]  }
 0x179   :  { %v4007_v15 = vld [vmem:[#allocation4 + $0x4] ss:$16 sps:$4 sm:$0xff]   ;;  %v4010_v16 = vld [vmem:[#allocation4 + $0xc] ss:$16 sps:$4 sm:$0xff]   ;;  %v4014_v22 = vld [vmem:[#allocation4 + $0x28] ss:$16 sps:$4 sm:$0xff]  }
 0x17a   :  { %1712 = vmatpush1.bf16.msra.mxu0 %v3915_v4  ;;  %1798 = vmatpush1.bf16.msra.mxu1 %v3918_v5  ;;  %v3992_v4 = vld [vmem:[#allocation2 + $0x3ac] ss:$16 sps:$4 sm:$0xff]   ;;  %v3987_v5 = vld [vmem:[#allocation2 + $0x3a0] ss:$16 sps:$4 sm:$0xff]   ;;  %v4013_v19 = vld [vmem:[#allocation4 + $0x24] ss:$16 sps:$4 sm:$0xff]  }
 0x17b   :  { %1713 = vmatprep.subr.bf16.mxu0 %v3923_v8  ;;  %1799 = vmatprep.subr.bf16.mxu1 %v3926_v9  ;;  %v3998_v8 = vld [vmem:[#allocation2 + $0x3cc] ss:$16 sps:$4 sm:$0xff]   ;;  %v3993_v9 = vld [vmem:[#allocation2 + $0x3c0] ss:$16 sps:$4 sm:$0xff]   ;;  %v4019_v24 = vld [vmem:[#allocation4 + $0x44] ss:$16 sps:$4 sm:$0xff]  }
 0x17e   :  { %1714 = vmatpush1.bf16.msra.mxu0 %v3921_v17  ;;  %1800 = vmatpush1.bf16.msra.mxu1 %v3924_v18  ;;  %v4005_v17 = vld [vmem:[#allocation4] ss:$16 sps:$4 sm:$0xff]   ;;  %v4008_v18 = vld [vmem:[#allocation4 + $0x8] ss:$16 sps:$4 sm:$0xff]  }
 0x17f   :  { %1715 = vmatprep.subr.bf16.mxu0 %v3929_v20  ;;  %1801 = vmatprep.subr.bf16.mxu1 %v3932_v21  ;;  %v4016_v20 = vld [vmem:[#allocation4 + $0x2c] ss:$16 sps:$4 sm:$0xff]   ;;  %v4011_v21 = vld [vmem:[#allocation4 + $0x20] ss:$16 sps:$4 sm:$0xff]  }
 0x182   :  { %1716 = vmatpush1.bf16.msra.mxu0 %v3927_v25  ;;  %1802 = vmatpush1.bf16.msra.mxu1 %v3930_v26  ;;  %v4022_v25 = vld [vmem:[#allocation4 + $0x4c] ss:$16 sps:$4 sm:$0xff]   ;;  %v4017_v26 = vld [vmem:[#allocation4 + $0x40] ss:$16 sps:$4 sm:$0xff]  }
 0x183   :  { %1717 = vmatprep.subr.bf16.mxu0 %v3935_v27  ;;  %1803 = vmatprep.subr.bf16.mxu1 %v3938_v28  ;;  %v4020_v27 = vld [vmem:[#allocation4 + $0x48] ss:$16 sps:$4 sm:$0xff]   ;;  %v4025_v28 = vld [vmem:[#allocation4 + $0x64] ss:$16 sps:$4 sm:$0xff]  }
 0x186   :  { %1718 = vmatpush1.bf16.msra.mxu0 %v3933_v29  ;;  %1804 = vmatpush1.bf16.msra.mxu1 %v3936_v30  ;;  %v4028_v29 = vld [vmem:[#allocation4 + $0x6c] ss:$16 sps:$4 sm:$0xff]   ;;  %v4023_v30 = vld [vmem:[#allocation4 + $0x60] ss:$16 sps:$4 sm:$0xff]  }
 0x187   :  { %1719 = vmatprep.subr.bf16.mxu0 %v3941_v31  ;;  %1805 = vmatprep.subr.bf16.mxu1 %v3944_v32  ;;  %v4031_v31 = vld [vmem:[#allocation4 + $0x84] ss:$16 sps:$4 sm:$0xff]   ;;  %v4034_v32 = vld [vmem:[#allocation4 + $0x8c] ss:$16 sps:$4 sm:$0xff]  }
 0x18a   :  { %1720 = vmatpush1.bf16.msra.mxu0 %v3939_v33  ;;  %1806 = vmatpush1.bf16.msra.mxu1 %v3942_v34  ;;  %v4029_v33 = vld [vmem:[#allocation4 + $0x80] ss:$16 sps:$4 sm:$0xff]   ;;  %v4032_v34 = vld [vmem:[#allocation4 + $0x88] ss:$16 sps:$4 sm:$0xff]  }
 0x18b   :  { %1721 = vmatprep.subr.bf16.mxu0 %v3947_v35  ;;  %1807 = vmatprep.subr.bf16.mxu1 %v3950_v36  ;;  %v4037_v35 = vld [vmem:[#allocation4 + $0xa4] ss:$16 sps:$4 sm:$0xff]   ;;  %v4040_v36 = vld [vmem:[#allocation4 + $0xac] ss:$16 sps:$4 sm:$0xff]  }
 0x18e   :  { %1722 = vmatpush1.bf16.msra.mxu0 %v3945_v37  ;;  %1808 = vmatpush1.bf16.msra.mxu1 %v3948_v38  ;;  %v4035_v37 = vld [vmem:[#allocation4 + $0xa0] ss:$16 sps:$4 sm:$0xff]   ;;  %v4038_v38 = vld [vmem:[#allocation4 + $0xa8] ss:$16 sps:$4 sm:$0xff]  }
 0x18f   :  { %1723 = vmatprep.subr.bf16.mxu0 %v3953_v39  ;;  %1809 = vmatprep.subr.bf16.mxu1 %v3956_v41  ;;  %v4043_v39 = vld [vmem:[#allocation4 + $0xc4] ss:$16 sps:$4 sm:$0xff]   ;;  %v4046_v41 = vld [vmem:[#allocation4 + $0xcc] ss:$16 sps:$4 sm:$0xff]  }
 0x192   :  { %1724 = vmatpush1.bf16.msra.mxu0 %v3951_v43  ;;  %1810 = vmatpush1.bf16.msra.mxu1 %v3954_v44  ;;  %v4041_v43 = vld [vmem:[#allocation4 + $0xc0] ss:$16 sps:$4 sm:$0xff]   ;;  %v4044_v44 = vld [vmem:[#allocation4 + $0xc8] ss:$16 sps:$4 sm:$0xff]  }
 0x193   :  { %1725 = vmatprep.subr.bf16.mxu0 %v3959_v45  ;;  %1811 = vmatprep.subr.bf16.mxu1 %v3962_v46  ;;  %v4049_v45 = vld [vmem:[#allocation4 + $0xe4] ss:$16 sps:$4 sm:$0xff]   ;;  %v4052_v46 = vld [vmem:[#allocation4 + $0xec] ss:$16 sps:$4 sm:$0xff]  }
 0x196   :  { %1726 = vmatpush1.bf16.msra.mxu0 %v3957_v47  ;;  %1812 = vmatpush1.bf16.msra.mxu1 %v3960_v48  ;;  %v4047_v47 = vld [vmem:[#allocation4 + $0xe0] ss:$16 sps:$4 sm:$0xff]   ;;  %v4050_v48 = vld [vmem:[#allocation4 + $0xe8] ss:$16 sps:$4 sm:$0xff]  }
 0x197   :  { %1727 = vmatprep.subr.bf16.mxu0 %v3965_v49  ;;  %1813 = vmatprep.subr.bf16.mxu1 %v3968_v50  ;;  %v4055_v49 = vld [vmem:[#allocation4 + $0x104] ss:$16 sps:$4 sm:$0xff]   ;;  %v4058_v50 = vld [vmem:[#allocation4 + $0x10c] ss:$16 sps:$4 sm:$0xff]  }
 0x19a   :  { %1728 = vmatpush1.bf16.msra.mxu0 %v3963_v51  ;;  %1814 = vmatpush1.bf16.msra.mxu1 %v3966_v52  ;;  %v4053_v51 = vld [vmem:[#allocation4 + $0x100] ss:$16 sps:$4 sm:$0xff]   ;;  %v4056_v52 = vld [vmem:[#allocation4 + $0x108] ss:$16 sps:$4 sm:$0xff]  }
 0x19b   :  { %1729 = vmatprep.subr.bf16.mxu0 %v3971_v54  ;;  %1815 = vmatprep.subr.bf16.mxu1 %v3974_v55  ;;  %v4061_v54 = vld [vmem:[#allocation4 + $0x124] ss:$16 sps:$4 sm:$0xff]   ;;  %v4064_v55 = vld [vmem:[#allocation4 + $0x12c] ss:$16 sps:$4 sm:$0xff]  }
 0x19e   :  { %1730 = vmatpush1.bf16.msra.mxu0 %v3969_v57  ;;  %1816 = vmatpush1.bf16.msra.mxu1 %v3972_v58  ;;  %v4059_v57 = vld [vmem:[#allocation4 + $0x120] ss:$16 sps:$4 sm:$0xff]   ;;  %v4062_v58 = vld [vmem:[#allocation4 + $0x128] ss:$16 sps:$4 sm:$0xff]  }
 0x19f   :  { %1731 = vmatprep.subr.bf16.mxu0 %v3977_v59  ;;  %1817 = vmatprep.subr.bf16.mxu1 %v3980_v60  ;;  %v4067_v59 = vld [vmem:[#allocation4 + $0x144] ss:$16 sps:$4 sm:$0xff]   ;;  %v4070_v60 = vld [vmem:[#allocation4 + $0x14c] ss:$16 sps:$4 sm:$0xff]  }
 0x1a2   :  { %1732 = vmatpush1.bf16.msra.mxu0 %v3975_v61  ;;  %1818 = vmatpush1.bf16.msra.mxu1 %v3978_v62  ;;  %v4065_v61 = vld [vmem:[#allocation4 + $0x140] ss:$16 sps:$4 sm:$0xff]   ;;  %v4068_v62 = vld [vmem:[#allocation4 + $0x148] ss:$16 sps:$4 sm:$0xff]  }
 0x1a3   :  { %1733 = vmatprep.subr.bf16.mxu0 %v3983_v63  ;;  %1819 = vmatprep.subr.bf16.mxu1 %v3986_v0  ;;  %v4073_v63 = vld [vmem:[#allocation4 + $0x164] ss:$16 sps:$4 sm:$0xff]   ;;  %v4076_v0 = vld [vmem:[#allocation4 + $0x16c] ss:$16 sps:$4 sm:$0xff]  }
 0x1a6   :  { %1734 = vmatpush1.bf16.msra.mxu0 %v3981_v1  ;;  %1820 = vmatpush1.bf16.msra.mxu1 %v3984_v2  ;;  %v4071_v1 = vld [vmem:[#allocation4 + $0x160] ss:$16 sps:$4 sm:$0xff]   ;;  %v4074_v2 = vld [vmem:[#allocation4 + $0x168] ss:$16 sps:$4 sm:$0xff]  }
 0x1a7   :  { %1735 = vmatprep.subr.bf16.mxu0 %v3989_v3  ;;  %1821 = vmatprep.subr.bf16.mxu1 %v3992_v4  ;;  %v4079_v3 = vld [vmem:[#allocation4 + $0x184] ss:$16 sps:$4 sm:$0xff]   ;;  %v4082_v4 = vld [vmem:[#allocation4 + $0x18c] ss:$16 sps:$4 sm:$0xff]  }
 0x1aa   :  { %1736 = vmatpush1.bf16.msra.mxu0 %v3987_v5  ;;  %1822 = vmatpush1.bf16.msra.mxu1 %v3990_v6  ;;  %v4077_v5 = vld [vmem:[#allocation4 + $0x180] ss:$16 sps:$4 sm:$0xff]   ;;  %v4080_v6 = vld [vmem:[#allocation4 + $0x188] ss:$16 sps:$4 sm:$0xff]  }
 0x1ab   :  { %1737 = vmatprep.subr.bf16.mxu0 %v3995_v7  ;;  %1823 = vmatprep.subr.bf16.mxu1 %v3998_v8  ;;  %v4085_v7 = vld [vmem:[#allocation4 + $0x1a4] ss:$16 sps:$4 sm:$0xff]   ;;  %v4088_v8 = vld [vmem:[#allocation4 + $0x1ac] ss:$16 sps:$4 sm:$0xff]  }
 0x1ae   :  { %1738 = vmatpush1.bf16.msra.mxu0 %v3993_v9  ;;  %1824 = vmatpush1.bf16.msra.mxu1 %v3996_v10  ;;  %v4083_v9 = vld [vmem:[#allocation4 + $0x1a0] ss:$16 sps:$4 sm:$0xff]   ;;  %v4086_v10 = vld [vmem:[#allocation4 + $0x1a8] ss:$16 sps:$4 sm:$0xff]  }
 0x1af   :  { %1739 = vmatprep.subr.bf16.mxu0 %v4001_v11  ;;  %1825 = vmatprep.subr.bf16.mxu1 %v4004_v12  ;;  %v4091_v11 = vld [vmem:[#allocation4 + $0x1c4] ss:$16 sps:$4 sm:$0xff]   ;;  %v4094_v12 = vld [vmem:[#allocation4 + $0x1cc] ss:$16 sps:$4 sm:$0xff]  }
 0x1b2   :  { %1740 = vmatpush1.bf16.msra.mxu0 %v3999_v13  ;;  %1826 = vmatpush1.bf16.msra.mxu1 %v4002_v14  ;;  %v4089_v13 = vld [vmem:[#allocation4 + $0x1c0] ss:$16 sps:$4 sm:$0xff]   ;;  %v4092_v14 = vld [vmem:[#allocation4 + $0x1c8] ss:$16 sps:$4 sm:$0xff]  }
 0x1b3   :  { %2640 = vmatprep.subr.bf16.mxu0 %v4007_v15  ;;  %2726 = vmatprep.subr.bf16.mxu1 %v4010_v16  ;;  %v4097_v15 = vld [vmem:[#allocation4 + $0x1e4] ss:$16 sps:$4 sm:$0xff]   ;;  %v4100_v16 = vld [vmem:[#allocation4 + $0x1ec] ss:$16 sps:$4 sm:$0xff]  }
 0x1b5   :  { %1742 = vmatmul.mubr.bf16.vlgmr.msra.gmra.mrb[4].mxu0 %v4712_v23  ;;  %1828 = vmatmul.mubr.bf16.vlgmr.msra.gmra.mrb[4].mxu1 %v4712_v23  ;;  %v4026_v23 = vld [vmem:[#allocation4 + $0x68] ss:$16 sps:$4 sm:$0xff]  }
 0x1b6   :  { %2641 = vmatpush1.bf16.msra.mxu0 %v4005_v17  ;;  %2727 = vmatpush1.bf16.msra.mxu1 %v4008_v18  ;;  %v4095_v17 = vld [vmem:[#allocation4 + $0x1e0] ss:$16 sps:$4 sm:$0xff]   ;;  %v4098_v18 = vld [vmem:[#allocation4 + $0x1e8] ss:$16 sps:$4 sm:$0xff]  }
 0x1b7   :  { %2642 = vmatprep.subr.bf16.mxu0 %v4013_v19  ;;  %2728 = vmatprep.subr.bf16.mxu1 %v4016_v20  ;;  %v4103_v19 = vld [vmem:[#allocation4 + $0x204] ss:$16 sps:$4 sm:$0xff]   ;;  %v4106_v20 = vld [vmem:[#allocation4 + $0x20c] ss:$16 sps:$4 sm:$0xff]  }
 0x1ba   :  { %2643 = vmatpush1.bf16.msra.mxu0 %v4011_v21  ;;  %2729 = vmatpush1.bf16.msra.mxu1 %v4014_v22  ;;  %v1004_v21 = vld [vmem:[%s4747_s4] sm:$0xf] }
 0x1bb   :  { %2644 = vmatprep.subr.bf16.mxu0 %v4019_v24  ;;  %2730 = vmatprep.subr.bf16.mxu1 %v4022_v25  ;;  %v1009_v22 = vrot.slane %v1004_v21, %v4697_v40  ;;  %v1017_v24 = vrot.slane %v1004_v21, %v4706_v53  ;;  %v1013_v25 = vrot.slane %v1004_v21, %v4702_v42 }
 0x1be   :  { %2645 = vmatpush1.bf16.msra.mxu0 %v4017_v26  ;;  %2731 = vmatpush1.bf16.msra.mxu1 %v4020_v27  ;;  %v1021_v26 = vrot.slane %v1004_v21, %v4708_v56  ;;  %v4148_v21 = vld [vmem:[#allocation4 + $0x2ec] ss:$16 sps:$4 sm:$0xff]  }
 0x1bf   :  { %2646 = vmatprep.subr.bf16.mxu0 %v4025_v28  ;;  %2732 = vmatprep.subr.bf16.mxu1 %v4028_v29 }
 0x1c2   :  { %2647 = vmatpush1.bf16.msra.mxu0 %v4023_v30  ;;  %2733 = vmatpush1.bf16.msra.mxu1 %v4026_v23 }
 0x1c3   :  { %2648 = vmatprep.subr.bf16.mxu0 %v4031_v31  ;;  %2734 = vmatprep.subr.bf16.mxu1 %v4034_v32 }
 0x1c6   :  { %2649 = vmatpush1.bf16.msra.mxu0 %v4029_v33  ;;  %2735 = vmatpush1.bf16.msra.mxu1 %v4032_v34 }
 0x1c7   :  { %2650 = vmatprep.subr.bf16.mxu0 %v4037_v35  ;;  %2736 = vmatprep.subr.bf16.mxu1 %v4040_v36 }
 0x1ca   :  { %2651 = vmatpush1.bf16.msra.mxu0 %v4035_v37  ;;  %2737 = vmatpush1.bf16.msra.mxu1 %v4038_v38 }
 0x1cb   :  { %2652 = vmatprep.subr.bf16.mxu0 %v4043_v39  ;;  %2738 = vmatprep.subr.bf16.mxu1 %v4046_v41 }
 0x1ce   :  { %2653 = vmatpush1.bf16.msra.mxu0 %v4041_v43  ;;  %2739 = vmatpush1.bf16.msra.mxu1 %v4044_v44 }
 0x1cf   :  { %2654 = vmatprep.subr.bf16.mxu0 %v4049_v45  ;;  %2740 = vmatprep.subr.bf16.mxu1 %v4052_v46 }
 0x1d2   :  { %2655 = vmatpush1.bf16.msra.mxu0 %v4047_v47  ;;  %2741 = vmatpush1.bf16.msra.mxu1 %v4050_v48 }
 0x1d3   :  { %2656 = vmatprep.subr.bf16.mxu0 %v4055_v49  ;;  %2742 = vmatprep.subr.bf16.mxu1 %v4058_v50 }
 0x1d6   :  { %2657 = vmatpush1.bf16.msra.mxu0 %v4053_v51  ;;  %2743 = vmatpush1.bf16.msra.mxu1 %v4056_v52 }
 0x1d7   :  { %2658 = vmatprep.subr.bf16.mxu0 %v4061_v54  ;;  %2744 = vmatprep.subr.bf16.mxu1 %v4064_v55 }
 0x1da   :  { %2659 = vmatpush1.bf16.msra.mxu0 %v4059_v57  ;;  %2745 = vmatpush1.bf16.msra.mxu1 %v4062_v58  ;;  %v4101_v58 = vld [vmem:[#allocation4 + $0x200] ss:$16 sps:$4 sm:$0xff]  }
 0x1db   :  { %2660 = vmatprep.subr.bf16.mxu0 %v4067_v59  ;;  %2746 = vmatprep.subr.bf16.mxu1 %v4070_v60  ;;  %v4104_v59 = vld [vmem:[#allocation4 + $0x208] ss:$16 sps:$4 sm:$0xff]   ;;  %v4109_v60 = vld [vmem:[#allocation4 + $0x224] ss:$16 sps:$4 sm:$0xff]  }
 0x1de   :  { %2661 = vmatpush1.bf16.msra.mxu0 %v4065_v61  ;;  %2747 = vmatpush1.bf16.msra.mxu1 %v4068_v62  ;;  %v4112_v61 = vld [vmem:[#allocation4 + $0x22c] ss:$16 sps:$4 sm:$0xff]   ;;  %v4107_v62 = vld [vmem:[#allocation4 + $0x220] ss:$16 sps:$4 sm:$0xff]  }
 0x1df   :  { %2662 = vmatprep.subr.bf16.mxu0 %v4073_v63  ;;  %2748 = vmatprep.subr.bf16.mxu1 %v4076_v0  ;;  %v4110_v63 = vld [vmem:[#allocation4 + $0x228] ss:$16 sps:$4 sm:$0xff]   ;;  %v4115_v0 = vld [vmem:[#allocation4 + $0x244] ss:$16 sps:$4 sm:$0xff]  }
 0x1e2   :  { %2663 = vmatpush1.bf16.msra.mxu0 %v4071_v1  ;;  %2749 = vmatpush1.bf16.msra.mxu1 %v4074_v2  ;;  %v4118_v1 = vld [vmem:[#allocation4 + $0x24c] ss:$16 sps:$4 sm:$0xff]   ;;  %v4113_v2 = vld [vmem:[#allocation4 + $0x240] ss:$16 sps:$4 sm:$0xff]  }
 0x1e3   :  { %2664 = vmatprep.subr.bf16.mxu0 %v4079_v3  ;;  %2750 = vmatprep.subr.bf16.mxu1 %v4082_v4  ;;  %v4116_v3 = vld [vmem:[#allocation4 + $0x248] ss:$16 sps:$4 sm:$0xff]   ;;  %v4121_v4 = vld [vmem:[#allocation4 + $0x264] ss:$16 sps:$4 sm:$0xff]  }
 0x1e6   :  { %2665 = vmatpush1.bf16.msra.mxu0 %v4077_v5  ;;  %2751 = vmatpush1.bf16.msra.mxu1 %v4080_v6  ;;  %v4124_v5 = vld [vmem:[#allocation4 + $0x26c] ss:$16 sps:$4 sm:$0xff]   ;;  %v4119_v6 = vld [vmem:[#allocation4 + $0x260] ss:$16 sps:$4 sm:$0xff]  }
 0x1e7   :  { %2666 = vmatprep.subr.bf16.mxu0 %v4085_v7  ;;  %2752 = vmatprep.subr.bf16.mxu1 %v4088_v8  ;;  %v4122_v7 = vld [vmem:[#allocation4 + $0x268] ss:$16 sps:$4 sm:$0xff]   ;;  %v4127_v8 = vld [vmem:[#allocation4 + $0x284] ss:$16 sps:$4 sm:$0xff]  }
 0x1ea   :  { %2667 = vmatpush1.bf16.msra.mxu0 %v4083_v9  ;;  %2753 = vmatpush1.bf16.msra.mxu1 %v4086_v10  ;;  %v4130_v9 = vld [vmem:[#allocation4 + $0x28c] ss:$16 sps:$4 sm:$0xff]   ;;  %v4125_v10 = vld [vmem:[#allocation4 + $0x280] ss:$16 sps:$4 sm:$0xff]  }
 0x1eb   :  { %2668 = vmatprep.subr.bf16.mxu0 %v4091_v11  ;;  %2754 = vmatprep.subr.bf16.mxu1 %v4094_v12  ;;  %v4128_v11 = vld [vmem:[#allocation4 + $0x288] ss:$16 sps:$4 sm:$0xff]   ;;  %v4133_v12 = vld [vmem:[#allocation4 + $0x2a4] ss:$16 sps:$4 sm:$0xff]  }
 0x1ee   :  { %2669 = vmatpush1.bf16.msra.mxu0 %v4089_v13  ;;  %2755 = vmatpush1.bf16.msra.mxu1 %v4092_v14  ;;  %v4136_v13 = vld [vmem:[#allocation4 + $0x2ac] ss:$16 sps:$4 sm:$0xff]   ;;  %v4131_v14 = vld [vmem:[#allocation4 + $0x2a0] ss:$16 sps:$4 sm:$0xff]  }
 0x1ef   :  { %2670 = vmatprep.subr.bf16.mxu0 %v4097_v15  ;;  %2756 = vmatprep.subr.bf16.mxu1 %v4100_v16  ;;  %v4134_v15 = vld [vmem:[#allocation4 + $0x2a8] ss:$16 sps:$4 sm:$0xff]   ;;  %v4139_v16 = vld [vmem:[#allocation4 + $0x2c4] ss:$16 sps:$4 sm:$0xff]  }
 0x1f2   :  { %2671 = vmatpush1.bf16.msra.mxu0 %v4095_v17  ;;  %2757 = vmatpush1.bf16.msra.mxu1 %v4098_v18  ;;  %v4142_v17 = vld [vmem:[#allocation4 + $0x2cc] ss:$16 sps:$4 sm:$0xff]   ;;  %v4137_v18 = vld [vmem:[#allocation4 + $0x2c0] ss:$16 sps:$4 sm:$0xff]  }
 0x1f3   :  { %2683 = vmatprep.subr.bf16.mxu0 %v4103_v19  ;;  %2769 = vmatprep.subr.bf16.mxu1 %v4106_v20  ;;  %v4140_v19 = vld [vmem:[#allocation4 + $0x2c8] ss:$16 sps:$4 sm:$0xff]   ;;  %v4145_v20 = vld [vmem:[#allocation4 + $0x2e4] ss:$16 sps:$4 sm:$0xff]  }
 0x288   :  { %v1743_v27 = vpop.f32.mrb[4].mxu0  ;;  %v1829_v28 = vpop.f32.mrb[4].mxu1 }
 0x289   :  { %v3617_v29 = vadd.f32 %v1743_v27, %v1009_v22  ;;  %v3621_v30 = vadd.f32 %v1829_v28, %v1017_v24  ;;  %v1745_v23 = vpop.f32.mrb[5].mxu0  ;;  %v1831_v31 = vpop.f32.mrb[5].mxu1  ;;  %v4149_v27 = vld [vmem:[#allocation4 + $0x300] ss:$16 sps:$4 sm:$0xff]   ;;  %v4152_v28 = vld [vmem:[#allocation4 + $0x308] ss:$16 sps:$4 sm:$0xff]  }
 0x28a   :  { %v3618_v32 = vadd.f32 %v1745_v23, %v1013_v25  ;;  %v3622_v33 = vadd.f32 %v1831_v31, %v1021_v26  ;;  %v1747_v34 = vpop.f32.mrb[6].mxu0  ;;  %v1833_v35 = vpop.f32.mrb[6].mxu1  ;;  %v4155_v23 = vld [vmem:[#allocation4 + $0x320] ss:$16 sps:$4 sm:$0xff]   ;;  %v4158_v31 = vld [vmem:[#allocation4 + $0x328] ss:$16 sps:$4 sm:$0xff]  }
 0x28b   :  { %v3619_v36 = vadd.f32 %v1747_v34, %v1009_v22  ;;  %v3623_v37 = vadd.f32 %v1833_v35, %v1017_v24  ;;  %v1749_v38 = vpop.f32.mrb[7].mxu0  ;;  %v1835_v39 = vpop.f32.mrb[7].mxu1  ;;  %v1838_v44 = vmax.f32 %v3617_v29, 0.0  ;;  %v1840_v45 = vmax.f32 %v3621_v30, 0.0  ;;  %v4143_v22 = vld [vmem:[#allocation4 + $0x2e0] ss:$16 sps:$4 sm:$0xff]  }
 0x28c   :  { %v3620_v41 = vadd.f32 %v1749_v38, %v1013_v25  ;;  %v3624_v43 = vadd.f32 %v1835_v39, %v1021_v26  ;;  %v1839_v48 = vmax.f32 %v3618_v32, 0.0  ;;  %v1841_v49 = vmax.f32 %v3622_v33, 0.0  ;;  %v4146_v24 = vld [vmem:[#allocation4 + $0x2e8] ss:$16 sps:$4 sm:$0xff]   ;;  %v4151_v25 = vld [vmem:[#allocation4 + $0x304] ss:$16 sps:$4 sm:$0xff]  }
 0x28d   :  { %v1842_v46 = vmax.f32 %v3619_v36, 0.0  ;;  %v1844_v47 = vmax.f32 %v3623_v37, 0.0  ;;  %v4154_v26 = vld [vmem:[#allocation4 + $0x30c] ss:$16 sps:$4 sm:$0xff]   ;;  %v4157_v29 = vld [vmem:[#allocation4 + $0x324] ss:$16 sps:$4 sm:$0xff]  }
 0x28e   :  { %v1843_v50 = vmax.f32 %v3620_v41, 0.0  ;;  %v1845_v51 = vmax.f32 %v3624_v43, 0.0  ;;  %v4160_v30 = vld [vmem:[#allocation4 + $0x32c] ss:$16 sps:$4 sm:$0xff]   ;;  %v4163_v32 = vld [vmem:[#allocation4 + $0x344] ss:$16 sps:$4 sm:$0xff]  }
 0x28f   :  { %v1846_v52 = vpack.c.bf16 %v1842_v46, %v1838_v44  ;;  %v4723_v54 = vpack.c.bf16 %v1844_v47, %v1840_v45  ;;  %v4166_v33 = vld [vmem:[#allocation4 + $0x34c] ss:$16 sps:$4 sm:$0xff]   ;;  %v4161_v34 = vld [vmem:[#allocation4 + $0x340] ss:$16 sps:$4 sm:$0xff]   ;;  %v4164_v35 = vld [vmem:[#allocation4 + $0x348] ss:$16 sps:$4 sm:$0xff]  }
 0x290   :  { %v1847_v55 = vpack.c.bf16 %v1843_v50, %v1839_v48  ;;  %v1849_v57 = vpack.c.bf16 %v1845_v51, %v1841_v49  ;;  %v4169_v36 = vld [vmem:[#allocation4 + $0x364] ss:$16 sps:$4 sm:$0xff]   ;;  %v4172_v37 = vld [vmem:[#allocation4 + $0x36c] ss:$16 sps:$4 sm:$0xff]   ;;  %v4167_v38 = vld [vmem:[#allocation4 + $0x360] ss:$16 sps:$4 sm:$0xff]  }
 0x291   :  { %v4170_v39 = vld [vmem:[#allocation4 + $0x368] ss:$16 sps:$4 sm:$0xff]   ;;  %v4175_v41 = vld [vmem:[#allocation4 + $0x384] ss:$16 sps:$4 sm:$0xff]   ;;  %v4178_v43 = vld [vmem:[#allocation4 + $0x38c] ss:$16 sps:$4 sm:$0xff]  }
 0x292   :  { %2672 = vmatprep.mubr.bf16.mxu0 %v1847_v55  ;;  %2758 = vmatprep.mubr.bf16.mxu1 %v1847_v55  ;;  %v4173_v44 = vld [vmem:[#allocation4 + $0x380] ss:$16 sps:$4 sm:$0xff]   ;;  %v4176_v45 = vld [vmem:[#allocation4 + $0x388] ss:$16 sps:$4 sm:$0xff]   ;;  %v4181_v46 = vld [vmem:[#allocation4 + $0x3a4] ss:$16 sps:$4 sm:$0xff]  }
 0x293   :  { %2673 = vmatmul.mubr.bf16.vlgmr.msra.gmra.mrb[8].mxu0 %v1846_v52  ;;  %2759 = vmatmul.mubr.bf16.vlgmr.msra.gmra.mrb[8].mxu1 %v1846_v52  ;;  %v4184_v47 = vld [vmem:[#allocation4 + $0x3ac] ss:$16 sps:$4 sm:$0xff]   ;;  %v4179_v48 = vld [vmem:[#allocation4 + $0x3a0] ss:$16 sps:$4 sm:$0xff]   ;;  %v4182_v49 = vld [vmem:[#allocation4 + $0x3a8] ss:$16 sps:$4 sm:$0xff]  }
 0x294   :  { %2684 = vmatpush1.bf16.msra.mxu0 %v4101_v58  ;;  %2770 = vmatpush1.bf16.msra.mxu1 %v4104_v59  ;;  %v4187_v50 = vld [vmem:[#allocation4 + $0x3c4] ss:$16 sps:$4 sm:$0xff]   ;;  %v4190_v51 = vld [vmem:[#allocation4 + $0x3cc] ss:$16 sps:$4 sm:$0xff]   ;;  %v4185_v52 = vld [vmem:[#allocation4 + $0x3c0] ss:$16 sps:$4 sm:$0xff]  }
 0x295   :  { %2715 = vmatprep.mubr.bf16.mxu0 %v1849_v57  ;;  %2801 = vmatprep.mubr.bf16.mxu1 %v1849_v57  ;;  %v4188_v55 = vld [vmem:[#allocation4 + $0x3c8] ss:$16 sps:$4 sm:$0xff]   ;;  %v4193_v57 = vld [vmem:[#allocation4 + $0x3e4] ss:$16 sps:$4 sm:$0xff]   ;;  %v4196_v58 = vld [vmem:[#allocation4 + $0x3ec] ss:$16 sps:$4 sm:$0xff]  }
 0x296   :  { %2685 = vmatprep.subr.bf16.mxu0 %v4109_v60  ;;  %2771 = vmatprep.subr.bf16.mxu1 %v4112_v61  ;;  %v4191_v59 = vld [vmem:[#allocation4 + $0x3e0] ss:$16 sps:$4 sm:$0xff]   ;;  %v4194_v60 = vld [vmem:[#allocation4 + $0x3e8] ss:$16 sps:$4 sm:$0xff]  }
 0x297   :  { %v4197_v61 = vld [vmem:[#allocation6 + $0x40] sm:$0xff]  }
 0x298   :  { %2686 = vmatpush1.bf16.msra.mxu0 %v4107_v62  ;;  %2772 = vmatpush1.bf16.msra.mxu1 %v4110_v63  ;;  %v4198_v62 = vld [vmem:[#allocation6 + $0xc0] sm:$0xff]  }
 0x299   :  { %2687 = vmatprep.subr.bf16.mxu0 %v4115_v0  ;;  %2773 = vmatprep.subr.bf16.mxu1 %v4118_v1  ;;  %v4199_v63 = vld [vmem:[#allocation6] sm:$0xff]   ;;  %v4201_v1 = vld [vmem:[#allocation6 + $0x48] sm:$0xff]  }
 0x29a   :  { %v4200_v0 = vld [vmem:[#allocation6 + $0x80] sm:$0xff]  }
 0x29c   :  { %2688 = vmatpush1.bf16.msra.mxu0 %v4113_v2  ;;  %2774 = vmatpush1.bf16.msra.mxu1 %v4116_v3  ;;  %v4202_v2 = vld [vmem:[#allocation6 + $0xc8] sm:$0xff]  }
 0x29d   :  { %2689 = vmatprep.subr.bf16.mxu0 %v4121_v4  ;;  %2775 = vmatprep.subr.bf16.mxu1 %v4124_v5  ;;  %v4203_v3 = vld [vmem:[#allocation6 + $0x8] sm:$0xff]   ;;  %v4205_v5 = vld [vmem:[#allocation6 + $0x50] sm:$0xff]  }
 0x29e   :  { %v4204_v4 = vld [vmem:[#allocation6 + $0x88] sm:$0xff]  }
 0x2a0   :  { %2690 = vmatpush1.bf16.msra.mxu0 %v4119_v6  ;;  %2776 = vmatpush1.bf16.msra.mxu1 %v4122_v7  ;;  %v4206_v6 = vld [vmem:[#allocation6 + $0xd0] sm:$0xff]  }
 0x2a1   :  { %2691 = vmatprep.subr.bf16.mxu0 %v4127_v8  ;;  %2777 = vmatprep.subr.bf16.mxu1 %v4130_v9  ;;  %v4207_v7 = vld [vmem:[#allocation6 + $0x10] sm:$0xff]   ;;  %v4209_v9 = vld [vmem:[#allocation6 + $0x58] sm:$0xff]  }
 0x2a2   :  { %v4208_v8 = vld [vmem:[#allocation6 + $0x90] sm:$0xff]  }
 0x2a4   :  { %2692 = vmatpush1.bf16.msra.mxu0 %v4125_v10  ;;  %2778 = vmatpush1.bf16.msra.mxu1 %v4128_v11  ;;  %v4210_v10 = vld [vmem:[#allocation6 + $0xd8] sm:$0xff]  }
 0x2a5   :  { %2693 = vmatprep.subr.bf16.mxu0 %v4133_v12  ;;  %2779 = vmatprep.subr.bf16.mxu1 %v4136_v13  ;;  %v4211_v11 = vld [vmem:[#allocation6 + $0x18] sm:$0xff]   ;;  %v4213_v12 = vld [vmem:[#allocation6 + $0x60] sm:$0xff]  }
 0x2a6   :  { %v4214_v13 = vld [vmem:[#allocation6 + $0xe0] sm:$0xff]  }
 0x2a8   :  { %2694 = vmatpush1.bf16.msra.mxu0 %v4131_v14  ;;  %2780 = vmatpush1.bf16.msra.mxu1 %v4134_v15  ;;  %v4215_v14 = vld [vmem:[#allocation6 + $0x20] sm:$0xff]  }
 0x2a9   :  { %2695 = vmatprep.subr.bf16.mxu0 %v4139_v16  ;;  %2781 = vmatprep.subr.bf16.mxu1 %v4142_v17  ;;  %v4216_v15 = vld [vmem:[#allocation6 + $0xa0] sm:$0xff]   ;;  %v4217_v16 = vld [vmem:[#allocation6 + $0x68] sm:$0xff]  }
 0x2aa   :  { %v4218_v17 = vld [vmem:[#allocation6 + $0xe8] sm:$0xff]  }
 0x2ac   :  { %2696 = vmatpush1.bf16.msra.mxu0 %v4137_v18  ;;  %2782 = vmatpush1.bf16.msra.mxu1 %v4140_v19  ;;  %v4219_v18 = vld [vmem:[#allocation6 + $0x28] sm:$0xff]  }
 0x2ad   :  { %2697 = vmatprep.subr.bf16.mxu0 %v4145_v20  ;;  %2783 = vmatprep.subr.bf16.mxu1 %v4148_v21  ;;  %v4220_v19 = vld [vmem:[#allocation6 + $0xa8] sm:$0xff]   ;;  %v4221_v20 = vld [vmem:[#allocation6 + $0x70] sm:$0xff]  }
 0x2ae   :  { %v4222_v21 = vld [vmem:[#allocation6 + $0xf0] sm:$0xff]  }
 0x2b0   :  { %2698 = vmatpush1.bf16.msra.mxu0 %v4143_v22  ;;  %2784 = vmatpush1.bf16.msra.mxu1 %v4146_v24  ;;  %v4223_v22 = vld [vmem:[#allocation6 + $0x30] sm:$0xff]  }
 0x2b1   :  { %2699 = vmatprep.subr.bf16.mxu0 %v4151_v25  ;;  %2785 = vmatprep.subr.bf16.mxu1 %v4154_v26  ;;  %v4224_v24 = vld [vmem:[#allocation6 + $0xb0] sm:$0xff]   ;;  %v4225_v25 = vld [vmem:[#allocation6 + $0x78] sm:$0xff]  }
 0x2b2   :  { %v4226_v26 = vld [vmem:[#allocation6 + $0xf8] sm:$0xff]  }
 0x2b4   :  { %2700 = vmatpush1.bf16.msra.mxu0 %v4149_v27  ;;  %2786 = vmatpush1.bf16.msra.mxu1 %v4152_v28  ;;  %v4227_v27 = vld [vmem:[#allocation6 + $0x38] sm:$0xff]  }
 0x2b5   :  { %2701 = vmatprep.subr.bf16.mxu0 %v4157_v29  ;;  %2787 = vmatprep.subr.bf16.mxu1 %v4160_v30  ;;  %v4228_v28 = vld [vmem:[#allocation6 + $0xb8] sm:$0xff]   ;;  %v1978_v29 = vld [vmem:[%s4749_s6] sm:$0xf] }
 0x2b6   :  { %v1983_v30 = vrot.slane %v1978_v29, %v4697_v40 }
 0x2b8   :  { %2702 = vmatpush1.bf16.msra.mxu0 %v4155_v23  ;;  %2788 = vmatpush1.bf16.msra.mxu1 %v4158_v31  ;;  %v1991_v23 = vrot.slane %v1978_v29, %v4706_v53  ;;  %v1987_v31 = vrot.slane %v1978_v29, %v4702_v42 }
 0x2b9   :  { %2703 = vmatprep.subr.bf16.mxu0 %v4163_v32  ;;  %2789 = vmatprep.subr.bf16.mxu1 %v4166_v33  ;;  %v1995_v32 = vrot.slane %v1978_v29, %v4708_v56 }
 0x2bc   :  { %2704 = vmatpush1.bf16.msra.mxu0 %v4161_v34  ;;  %2790 = vmatpush1.bf16.msra.mxu1 %v4164_v35 }
 0x2bd   :  { %2705 = vmatprep.subr.bf16.mxu0 %v4169_v36  ;;  %2791 = vmatprep.subr.bf16.mxu1 %v4172_v37 }
 0x2c0   :  { %2706 = vmatpush1.bf16.msra.mxu0 %v4167_v38  ;;  %2792 = vmatpush1.bf16.msra.mxu1 %v4170_v39 }
 0x2c1   :  { %2707 = vmatprep.subr.bf16.mxu0 %v4175_v41  ;;  %2793 = vmatprep.subr.bf16.mxu1 %v4178_v43 }
 0x2c4   :  { %2708 = vmatpush1.bf16.msra.mxu0 %v4173_v44  ;;  %2794 = vmatpush1.bf16.msra.mxu1 %v4176_v45 }
 0x2c5   :  { %2709 = vmatprep.subr.bf16.mxu0 %v4181_v46  ;;  %2795 = vmatprep.subr.bf16.mxu1 %v4184_v47 }
 0x2c8   :  { %2710 = vmatpush1.bf16.msra.mxu0 %v4179_v48  ;;  %2796 = vmatpush1.bf16.msra.mxu1 %v4182_v49 }
 0x2c9   :  { %2711 = vmatprep.subr.bf16.mxu0 %v4187_v50  ;;  %2797 = vmatprep.subr.bf16.mxu1 %v4190_v51 }
 0x2cc   :  { %2712 = vmatpush1.bf16.msra.mxu0 %v4185_v52  ;;  %2798 = vmatpush1.bf16.msra.mxu1 %v4188_v55 }
 0x2cd   :  { %2713 = vmatprep.subr.bf16.mxu0 %v4193_v57  ;;  %2799 = vmatprep.subr.bf16.mxu1 %v4196_v58 }
 0x2d0   :  { %2714 = vmatpush1.bf16.msra.mxu0 %v4191_v59  ;;  %2800 = vmatpush1.bf16.msra.mxu1 %v4194_v60 }
 0x2d1   :  { %3565 = vmatprep.subr.bf16.mxu0 %v4197_v61  ;;  %3587 = vmatprep.subr.bf16.mxu1 %v4198_v62 }
 0x2d3   :  { %2716 = vmatmul.mubr.bf16.vlgmr.msra.gmra.mrb[8].mxu0 %v4723_v54  ;;  %2802 = vmatmul.mubr.bf16.vlgmr.msra.gmra.mrb[8].mxu1 %v4723_v54  ;;  %v4212_v54 = vld [vmem:[#allocation6 + $0x98] sm:$0xff]  }
 0x2d4   :  { %3566 = vmatpush3.bf16.msra.mxu0 %v4199_v63  ;;  %3588 = vmatpush3.bf16.msra.mxu1 %v4200_v0  ;;  %v3532_v0 = vld [vmem:[%s4751_s8] ss:$0 sm:$0xff] }
 0x2d5   :  { %3567 = vmatprep.subr.bf16.mxu0 %v4201_v1  ;;  %3589 = vmatprep.subr.bf16.mxu1 %v4202_v2 }
 0x2d8   :  { %3568 = vmatpush3.bf16.msra.mxu0 %v4203_v3  ;;  %3590 = vmatpush3.bf16.msra.mxu1 %v4204_v4 }
 0x2d9   :  { %3569 = vmatprep.subr.bf16.mxu0 %v4205_v5  ;;  %3591 = vmatprep.subr.bf16.mxu1 %v4206_v6 }
 0x2dc   :  { %3570 = vmatpush3.bf16.msra.mxu0 %v4207_v7  ;;  %3592 = vmatpush3.bf16.msra.mxu1 %v4208_v8 }
 0x2dd   :  { %3571 = vmatprep.subr.bf16.mxu0 %v4209_v9  ;;  %3593 = vmatprep.subr.bf16.mxu1 %v4210_v10 }
 0x2e0   :  { %3572 = vmatpush3.bf16.msra.mxu0 %v4211_v11  ;;  %3594 = vmatpush3.bf16.msra.mxu1 %v4212_v54 }
 0x2e1   :  { %3573 = vmatprep.subr.bf16.mxu0 %v4213_v12  ;;  %3595 = vmatprep.subr.bf16.mxu1 %v4214_v13 }
 0x2e4   :  { %3574 = vmatpush3.bf16.msra.mxu0 %v4215_v14  ;;  %3596 = vmatpush3.bf16.msra.mxu1 %v4216_v15 }
 0x2e5   :  { %3575 = vmatprep.subr.bf16.mxu0 %v4217_v16  ;;  %3597 = vmatprep.subr.bf16.mxu1 %v4218_v17 }
 0x2e8   :  { %3576 = vmatpush3.bf16.msra.mxu0 %v4219_v18  ;;  %3598 = vmatpush3.bf16.msra.mxu1 %v4220_v19 }
 0x2e9   :  { %3577 = vmatprep.subr.bf16.mxu0 %v4221_v20  ;;  %3599 = vmatprep.subr.bf16.mxu1 %v4222_v21 }
 0x2ec   :  { %3578 = vmatpush3.bf16.msra.mxu0 %v4223_v22  ;;  %3600 = vmatpush3.bf16.msra.mxu1 %v4224_v24 }
 0x2ed   :  { %3579 = vmatprep.subr.bf16.mxu0 %v4225_v25  ;;  %3601 = vmatprep.subr.bf16.mxu1 %v4226_v26 }
 0x2f0   :  { %3580 = vmatpush3.bf16.msra.mxu0 %v4227_v27  ;;  %3602 = vmatpush3.bf16.msra.mxu1 %v4228_v28 }
 0x3a6   :  { %v2717_v33 = vpop.f32.mrb[8].mxu0  ;;  %v2803_v34 = vpop.f32.mrb[8].mxu1 }
 0x3a7   :  { %v3625_v35 = vadd.f32 %v2717_v33, %v1983_v30  ;;  %v3629_v36 = vadd.f32 %v2803_v34, %v1991_v23  ;;  %v2719_v37 = vpop.f32.mrb[9].mxu0  ;;  %v2805_v38 = vpop.f32.mrb[9].mxu1 }
 0x3a8   :  { %v3626_v39 = vadd.f32 %v2719_v37, %v1987_v31  ;;  %v3630_v41 = vadd.f32 %v2805_v38, %v1995_v32  ;;  %v2721_v43 = vpop.f32.mrb[10].mxu0  ;;  %v2807_v44 = vpop.f32.mrb[10].mxu1 }
 0x3a9   :  { %v3627_v45 = vadd.f32 %v2721_v43, %v1983_v30  ;;  %v3631_v46 = vadd.f32 %v2807_v44, %v1991_v23  ;;  %v2723_v47 = vpop.f32.mrb[11].mxu0  ;;  %v2809_v40 = vpop.f32.mrb[11].mxu1  ;;  %v2812_v49 = vmax.f32 %v3625_v35, 0.0  ;;  %v2814_v42 = vmax.f32 %v3629_v36, 0.0 }
 0x3aa   :  { %v3628_v48 = vadd.f32 %v2723_v47, %v1987_v31  ;;  %v3632_v53 = vadd.f32 %v2809_v40, %v1995_v32  ;;  %v2813_v51 = vmax.f32 %v3626_v39, 0.0  ;;  %v2815_v52 = vmax.f32 %v3630_v41, 0.0 }
 0x3ab   :  { %v2816_v50 = vmax.f32 %v3627_v45, 0.0  ;;  %v2818_v56 = vmax.f32 %v3631_v46, 0.0 }
 0x3ac   :  { %v2817_v55 = vmax.f32 %v3628_v48, 0.0  ;;  %v2819_v57 = vmax.f32 %v3632_v53, 0.0 }
 0x3ad   :  { %v2820_v58 = vpack.c.bf16 %v2816_v50, %v2812_v49  ;;  %v2822_v59 = vpack.c.bf16 %v2818_v56, %v2814_v42 }
 0x3ae   :  { %v2821_v60 = vpack.c.bf16 %v2817_v55, %v2813_v51  ;;  %v2823_v61 = vpack.c.bf16 %v2819_v57, %v2815_v52 }
 0x3b0   :  { %3119 = vmatprep.mubr.bf16.mxu0 %v2821_v60  ;;  %3160 = vmatprep.mubr.bf16.mxu1 %v2823_v61 }
 0x3b1   :  { %3120 = vmatmul.mubr.bf16.vlgmr.msra.gmra.mrb[12].mxu0 %v2820_v58  ;;  %3161 = vmatmul.mubr.bf16.vlgmr.msra.gmra.mrb[12].mxu1 %v2822_v59 }
 0x484   :  { %v3581_v62 = vpop.f32.mrb[12].mxu0  ;;  %v3603_v63 = vpop.f32.mrb[12].mxu1 }
 0x485   :  { %v3582_v1 = vpop.f32.mrb[13].mxu0  ;;  %v3604_v2 = vpop.f32.mrb[13].mxu1 }
 0x486   :  { %v3583_v3 = vadd.f32 %v3582_v1, %v3581_v62  ;;  %v3605_v4 = vadd.f32 %v3604_v2, %v3603_v63  ;;  %v3584_v5 = vpop.f32.mrb[14].mxu0  ;;  %v3606_v6 = vpop.f32.mrb[14].mxu1 }
 0x487   :  { %v3585_v7 = vpop.f32.mrb[15].mxu0  ;;  %v3607_v8 = vpop.f32.mrb[15].mxu1 }
 0x488   :  { %v3122_v9 = vadd.f32 %v3583_v3, %v3532_v0  ;;  %v3586_v10 = vadd.f32 %v3585_v7, %v3584_v5  ;;  %v3608_v11 = vadd.f32 %v3607_v8, %v3606_v6 }
 0x48a   :  { %v3163_v54 = vadd.f32 %v3605_v4, %v3122_v9  ;;  %v3125_v12 = vadd.f32 %v3586_v10, %v3532_v0 }
 0x48c   :  { %3169 = vst [vmem:[%s4752_s9] sm:$0xff] %v3163_v54  ;;  %v3166_v13 = vadd.f32 %v3608_v11, %v3125_v12 }
 0x48e   :  { %3170 = vst [vmem:[%s4752_s9 + $0x8] sm:$0xff] %v3166_v13 }
 0x48f   :  { %3175 = vsyncpa [#allocation3], 1 }
 0x490   :  { %3176 = vsyncpa [#allocation5], 1 }

</bundles_post_ra>
